<compile_context>
chip_gen: v6e
topology: v6e:2x2x1
jax: 0.10.0
libtpu: 0.0.40
codegen_flags: <defaults>
</compile_context>

<pallas_src>
import math
import functools

import numpy as np
import jax
import jax.numpy as jnp
from jax.experimental import pallas as pl
from jax.experimental.pallas import tpu as pltpu


def mha_kernel(x_ref, wqkv_ref, bqkv_ref, wo_ref, bo_ref, o_ref, *,
               num_heads, channels):
    C, nh = channels, num_heads
    dh = C // nh                      # keep dh a multiple of 8 (sublane tile)

    x = x_ref[0]                                            # (C, tS), input dtype
    tS = x.shape[-1]
    mm_dtype = wqkv_ref.dtype                               # bf16 for the MXU

    # Fused q/k/v projection: one MXU dot, bf16 operands, f32 accumulation.
    # 1/sqrt(dh) is pre-folded into the wq rows / bq host-side.
    qkv = jnp.dot(wqkv_ref[...], x.astype(mm_dtype),
                  preferred_element_type=jnp.float32)
    qkv = qkv + bqkv_ref[...]                               # (3C, tS) f32

    qh = qkv[0 * C:1 * C].reshape(nh, dh, tS)               # (nh, dh, tS)
    kh = qkv[1 * C:2 * C].reshape(nh, dh, tS)
    vh = qkv[2 * C:3 * C].reshape(nh, dh, tS)

    # Cross-head logits, unrolled over the second head axis j so the largest
    # live tensor is (nh, dh, tS), never (nh, nh, dh, tS):
    #   logit_rows[j][i, 0, s] = sum_d qh[i, d, s] * kh[j, d, s]
    logit_rows = [
        jnp.sum(qh * kh[j][None, :, :], axis=1, keepdims=True)   # (nh, 1, tS)
        for j in range(nh)
    ]

    # Softmax over j, all in f32 (VPU max/add + EUP exp/reciprocal).
    m = logit_rows[0]
    for j in range(1, nh):
        m = jnp.maximum(m, logit_rows[j])
    e_rows = [jnp.exp(l - m) for l in logit_rows]                 # (nh, 1, tS)
    denom = e_rows[0]
    for j in range(1, nh):
        denom = denom + e_rows[j]
    inv = pl.reciprocal(denom, approx=True)                       # (nh, 1, tS)

    # Weighted sum, accumulated over j:
    #   attn[i, d, s] = sum_j softmax[i, j, s] * vh[j, d, s]
    attn = (e_rows[0] * inv) * vh[0][None, :, :]                  # (nh, dh, tS)
    for j in range(1, nh):
        attn = attn + (e_rows[j] * inv) * vh[j][None, :, :]
    attn = attn.reshape(C, tS)

    # Output projection (channel-major): bf16 operands, f32 accumulate.
    o = jnp.dot(wo_ref[...], attn.astype(mm_dtype),
                preferred_element_type=jnp.float32)
    o = o + bo_ref[...]                                           # (C, tS)
    o_ref[0] = o.astype(o_ref.dtype)


def prepare_params(params, num_heads, matmul_dtype=jnp.bfloat16):
    """One-time parameter prep: fuse QKV, fold 1/sqrt(dh), cast MXU weights."""
    C = params["wq"].shape[0]
    dh = C // num_heads
    scale = 1.0 / math.sqrt(dh)
    # Logits are linear in q -> fold the attention scale into the q projection.
    wq = params["wq"] * scale
    bq = params["bq"] * scale
    w_qkv = jnp.concatenate([wq, params["wkv"]], axis=0).astype(matmul_dtype)   # (3C, C)
    b_qkv = jnp.concatenate([bq, params["bkv"]], axis=0)
    b_qkv = b_qkv.reshape(3 * C, 1).astype(jnp.float32)
    w_o = params["wo"].astype(matmul_dtype)                                     # (C, C)
    b_o = params["bo"].reshape(C, 1).astype(jnp.float32)
    return {"w_qkv": w_qkv, "b_qkv": b_qkv, "w_o": w_o, "b_o": b_o}


def _select_tile_and_vmem(S):
    """Pick the token-tile (lane) width and scoped-VMEM limit per TPU generation."""
    kind = ""
    try:
        kind = jax.devices()[0].device_kind.lower()
    except Exception:
        pass
    if any(t in kind for t in ("v4", "v5", "v6")):       # 128 MiB VMEM parts
        candidates, vmem_limit = (1024, 512, 256, 128), 96 * 1024 * 1024
    elif "v7" in kind:                                    # 64 MiB VMEM per TC
        candidates, vmem_limit = (512, 256, 128), 40 * 1024 * 1024
    else:                                                 # unknown: compiler default
        candidates, vmem_limit = (512, 256, 128), None
    for t in candidates:
        if S % t == 0:
            return t, vmem_limit
    return S, vmem_limit                                  # small/odd S: full block


def multi_head_attention(x_nchw, prepared, num_heads, *, single_buffer_weights=True):
    B, C, H, W = x_nchw.shape
    assert C % num_heads == 0
    S = H * W

    # NCHW -> (B, C, S): pure reshape, no transpose (channel-major kernel,
    # tokens stay on the lane dimension end to end).
    x = x_nchw.reshape(B, C, S)

    tS, vmem_limit = _select_tile_and_vmem(S)
    # Ensure >= 2 parallel grid steps (v7x has 2 TensorCores sharded over the
    # parallel grid axes; a (1, 1) grid would idle one of them).
    if B * (S // tS) < 2:
        for t in (tS // 2, tS // 4):
            if t >= 128 and S % t == 0:
                tS = t
                break
    grid = (B, S // tS)

    def weight_spec(shape):
        # Constant index_map -> weights are DMA'd once and stay resident;
        # single-buffer them to halve their VMEM footprint.
        if single_buffer_weights:
            return pl.BlockSpec(shape, lambda b, s: (0, 0),
                                pipeline_mode=pl.Buffered(1))
        return pl.BlockSpec(shape, lambda b, s: (0, 0))

    kernel = functools.partial(mha_kernel, num_heads=num_heads, channels=C)

    cp_kwargs = dict(dimension_semantics=("parallel", "parallel"))
    if vmem_limit is not None:
        cp_kwargs["vmem_limit_bytes"] = vmem_limit

    out = pl.pallas_call(
        kernel,
        out_shape=jax.ShapeDtypeStruct((B, C, S), x.dtype),
        grid_spec=pltpu.PrefetchScalarGridSpec(
            num_scalar_prefetch=0,
            grid=grid,
            in_specs=[
                pl.BlockSpec((1, C, tS), lambda b, s: (b, 0, s)),    # x
                weight_spec((3 * C, C)),                             # W_qkv (bf16)
                weight_spec((3 * C, 1)),                             # b_qkv (f32)
                weight_spec((C, C)),                                 # W_o   (bf16)
                weight_spec((C, 1)),                                 # b_o   (f32)
            ],
            out_specs=pl.BlockSpec((1, C, tS), lambda b, s: (b, 0, s)),
        ),
        compiler_params=pltpu.CompilerParams(**cp_kwargs),
    )(x, prepared["w_qkv"], prepared["b_qkv"], prepared["w_o"], prepared["b_o"])

    # (B, C, S) -> NCHW: pure reshape, no transpose.
    return out.reshape(B, C, H, W)


def reference(x_nchw, params, num_heads):
    """Pure-JAX transcription of the PyTorch forward (same cross-head quirk)."""
    B, C, H, W = x_nchw.shape
    S = H * W
    x = jnp.transpose(x_nchw.reshape(B, C, S), (0, 2, 1))
    q = x @ params["wq"].T + params["bq"]
    kv = x @ params["wkv"].T + params["bkv"]
    k, v = kv[..., :C], kv[..., C:]
    nh, dh = num_heads, C // num_heads
    qh = q.reshape(B, S, nh, dh)
    kh = k.reshape(B, S, nh, dh)
    vh = v.reshape(B, S, nh, dh)
    attn = jnp.einsum("bsnd,bsmd->bsnm", qh, kh) / math.sqrt(dh)
    attn = jax.nn.softmax(attn, axis=-1)
    out = jnp.einsum("bsnm,bsmd->bsnd", attn, vh).reshape(B, S, C)
    o = out @ params["wo"].T + params["bo"]
    return jnp.transpose(o, (0, 2, 1)).reshape(B, C, H, W)


if __name__ == "__main__":
    # S = H*W = 256 (lane-dense, multiple of 128); C = 32, nh = 4 -> dh = 8.
    B, C, H, W = 2, 32, 16, 16
    num_heads = 4

    key = jax.random.PRNGKey(0)
    ks = jax.random.split(key, 7)
    params = {
        "wq":  jax.random.normal(ks[0], (C, C), jnp.float32) * 0.1,
        "bq":  jax.random.normal(ks[1], (C,), jnp.float32) * 0.1,
        "wkv": jax.random.normal(ks[2], (2 * C, C), jnp.float32) * 0.1,
        "bkv": jax.random.normal(ks[3], (2 * C,), jnp.float32) * 0.1,
        "wo":  jax.random.normal(ks[4], (C, C), jnp.float32) * 0.1,
        "bo":  jax.random.normal(ks[5], (C,), jnp.float32) * 0.1,
    }
    x = jax.random.normal(ks[6], (B, C, H, W), jnp.float32)

    prepared = prepare_params(params, num_heads)   # one-time: fuse / scale / bf16 cast

    try:
        out = jax.block_until_ready(multi_head_attention(x, prepared, num_heads))
    except Exception:
        # Fallback for JAX versions where pl.Buffered(1) on top-level BlockSpecs
        # is not supported: weights get default double-buffering (still correct).
        out = jax.block_until_ready(
            multi_head_attention(x, prepared, num_heads,
                                 single_buffer_weights=False))

    ref = jax.block_until_ready(reference(x, params, num_heads))
    # Tolerance covers bf16 MXU operands + pl.reciprocal(approx=True) in softmax.
    np.testing.assert_allclose(np.asarray(out), np.asarray(ref),
                               rtol=2e-2, atol=2e-2)
    print("KERNEL_OK")
</pallas_src>

<mosaic_0001>
module attributes {stable_mosaic.version = 11 : i64} {
  func.func @mha_kernel(%arg0: i32, %arg1: i32, %arg2: memref<1x32x256xf32, #tpu.memory_space<vmem>>, %arg3: memref<96x32xbf16, #tpu.memory_space<vmem>>, %arg4: memref<96x1xf32, #tpu.memory_space<vmem>>, %arg5: memref<32x32xbf16, #tpu.memory_space<vmem>>, %arg6: memref<32x1xf32, #tpu.memory_space<vmem>>, %arg7: memref<1x32x256xf32, #tpu.memory_space<vmem>>) attributes {dimension_semantics = [#tpu.dimension_semantics<parallel>, #tpu.dimension_semantics<parallel>], iteration_bounds = array<i64: 2, 1>, scalar_prefetch = 0 : i64, scratch_operands = 0 : i64, tpu.core_type = #tpu.core_type<tc>, window_params = [{transform_indices = @transform_0, window_bounds = array<i64: 1, 32, 256>}, {pipeline_mode = #tpu.pipeline_mode<synchronous>, transform_indices = @transform_1, window_bounds = array<i64: 96, 32>}, {pipeline_mode = #tpu.pipeline_mode<synchronous>, transform_indices = @transform_2, window_bounds = array<i64: 96, 1>}, {pipeline_mode = #tpu.pipeline_mode<synchronous>, transform_indices = @transform_3, window_bounds = array<i64: 32, 32>}, {pipeline_mode = #tpu.pipeline_mode<synchronous>, transform_indices = @transform_4, window_bounds = array<i64: 32, 1>}, {transform_indices = @transform_5, window_bounds = array<i64: 1, 32, 256>}]} {
    %c0 = arith.constant 0 : index
    %c0_0 = arith.constant 0 : index
    %c0_1 = arith.constant 0 : index
    %0 = vector.load %arg2[%c0, %c0_0, %c0_1] : memref<1x32x256xf32, #tpu.memory_space<vmem>>, vector<1x32x256xf32>
    %1 = vector.shape_cast %0 : vector<1x32x256xf32> to vector<32x256xf32>
    %c0_2 = arith.constant 0 : index
    %c0_3 = arith.constant 0 : index
    %2 = vector.load %arg3[%c0_2, %c0_3] : memref<96x32xbf16, #tpu.memory_space<vmem>>, vector<96x32xbf16>
    %3 = arith.truncf %1 : vector<32x256xf32> to vector<32x256xbf16>
    %cst = arith.constant dense<0.000000e+00> : vector<96x256xf32>
    %4 = tpu.matmul %2, %3, %cst {dimension_numbers = #tpu.dot_dimension_numbers<[1], [0], [0], [1], [0, 0, 1, 1], [], []>} : vector<96x32xbf16>, vector<32x256xbf16>, vector<96x256xf32> -> vector<96x256xf32>
    %c0_4 = arith.constant 0 : index
    %c0_5 = arith.constant 0 : index
    %5 = vector.load %arg4[%c0_4, %c0_5] : memref<96x1xf32, #tpu.memory_space<vmem>>, vector<96x1xf32>
    %6 = vector.broadcast %5 : vector<96x1xf32> to vector<96x256xf32>
    %7 = arith.addf %4, %6 : vector<96x256xf32>
    %8 = vector.extract_strided_slice %7 {offsets = [0, 0], sizes = [32, 256], strides = [1, 1]} : vector<96x256xf32> to vector<32x256xf32>
    %9 = vector.shape_cast %8 : vector<32x256xf32> to vector<4x8x256xf32>
    %10 = vector.extract_strided_slice %7 {offsets = [32, 0], sizes = [32, 256], strides = [1, 1]} : vector<96x256xf32> to vector<32x256xf32>
    %11 = vector.shape_cast %10 : vector<32x256xf32> to vector<4x8x256xf32>
    %12 = vector.extract_strided_slice %7 {offsets = [64, 0], sizes = [32, 256], strides = [1, 1]} : vector<96x256xf32> to vector<32x256xf32>
    %13 = vector.shape_cast %12 : vector<32x256xf32> to vector<4x8x256xf32>
    %14 = vector.extract_strided_slice %11 {offsets = [0, 0, 0], sizes = [1, 8, 256], strides = [1, 1, 1]} : vector<4x8x256xf32> to vector<1x8x256xf32>
    %15 = vector.shape_cast %14 : vector<1x8x256xf32> to vector<8x256xf32>
    %16 = vector.shape_cast %15 : vector<8x256xf32> to vector<1x8x256xf32>
    %17 = vector.broadcast %16 : vector<1x8x256xf32> to vector<4x8x256xf32>
    %18 = arith.mulf %9, %17 : vector<4x8x256xf32>
    %cst_6 = arith.constant dense<0.000000e+00> : vector<4x256xf32>
    %19 = vector.multi_reduction <add>, %18, %cst_6 [1] : vector<4x8x256xf32> to vector<4x256xf32>
    %20 = vector.shape_cast %19 : vector<4x256xf32> to vector<4x1x256xf32>
    %21 = vector.extract_strided_slice %11 {offsets = [1, 0, 0], sizes = [1, 8, 256], strides = [1, 1, 1]} : vector<4x8x256xf32> to vector<1x8x256xf32>
    %22 = vector.shape_cast %21 : vector<1x8x256xf32> to vector<8x256xf32>
    %23 = vector.shape_cast %22 : vector<8x256xf32> to vector<1x8x256xf32>
    %24 = vector.broadcast %23 : vector<1x8x256xf32> to vector<4x8x256xf32>
    %25 = arith.mulf %9, %24 : vector<4x8x256xf32>
    %cst_7 = arith.constant dense<0.000000e+00> : vector<4x256xf32>
    %26 = vector.multi_reduction <add>, %25, %cst_7 [1] : vector<4x8x256xf32> to vector<4x256xf32>
    %27 = vector.shape_cast %26 : vector<4x256xf32> to vector<4x1x256xf32>
    %28 = vector.extract_strided_slice %11 {offsets = [2, 0, 0], sizes = [1, 8, 256], strides = [1, 1, 1]} : vector<4x8x256xf32> to vector<1x8x256xf32>
    %29 = vector.shape_cast %28 : vector<1x8x256xf32> to vector<8x256xf32>
    %30 = vector.shape_cast %29 : vector<8x256xf32> to vector<1x8x256xf32>
    %31 = vector.broadcast %30 : vector<1x8x256xf32> to vector<4x8x256xf32>
    %32 = arith.mulf %9, %31 : vector<4x8x256xf32>
    %cst_8 = arith.constant dense<0.000000e+00> : vector<4x256xf32>
    %33 = vector.multi_reduction <add>, %32, %cst_8 [1] : vector<4x8x256xf32> to vector<4x256xf32>
    %34 = vector.shape_cast %33 : vector<4x256xf32> to vector<4x1x256xf32>
    %35 = vector.extract_strided_slice %11 {offsets = [3, 0, 0], sizes = [1, 8, 256], strides = [1, 1, 1]} : vector<4x8x256xf32> to vector<1x8x256xf32>
    %36 = vector.shape_cast %35 : vector<1x8x256xf32> to vector<8x256xf32>
    %37 = vector.shape_cast %36 : vector<8x256xf32> to vector<1x8x256xf32>
    %38 = vector.broadcast %37 : vector<1x8x256xf32> to vector<4x8x256xf32>
    %39 = arith.mulf %9, %38 : vector<4x8x256xf32>
    %cst_9 = arith.constant dense<0.000000e+00> : vector<4x256xf32>
    %40 = vector.multi_reduction <add>, %39, %cst_9 [1] : vector<4x8x256xf32> to vector<4x256xf32>
    %41 = vector.shape_cast %40 : vector<4x256xf32> to vector<4x1x256xf32>
    %42 = arith.maximumf %20, %27 : vector<4x1x256xf32>
    %43 = arith.maximumf %42, %34 : vector<4x1x256xf32>
    %44 = arith.maximumf %43, %41 : vector<4x1x256xf32>
    %45 = arith.subf %20, %44 : vector<4x1x256xf32>
    %46 = math.exp %45 : vector<4x1x256xf32>
    %47 = arith.subf %27, %44 : vector<4x1x256xf32>
    %48 = math.exp %47 : vector<4x1x256xf32>
    %49 = arith.subf %34, %44 : vector<4x1x256xf32>
    %50 = math.exp %49 : vector<4x1x256xf32>
    %51 = arith.subf %41, %44 : vector<4x1x256xf32>
    %52 = math.exp %51 : vector<4x1x256xf32>
    %53 = arith.addf %46, %48 : vector<4x1x256xf32>
    %54 = arith.addf %53, %50 : vector<4x1x256xf32>
    %55 = arith.addf %54, %52 : vector<4x1x256xf32>
    %56 = tpu.reciprocal %55 {approx = true} : vector<4x1x256xf32> -> vector<4x1x256xf32>
    %57 = arith.mulf %46, %56 : vector<4x1x256xf32>
    %58 = vector.extract_strided_slice %13 {offsets = [0, 0, 0], sizes = [1, 8, 256], strides = [1, 1, 1]} : vector<4x8x256xf32> to vector<1x8x256xf32>
    %59 = vector.shape_cast %58 : vector<1x8x256xf32> to vector<8x256xf32>
    %60 = vector.shape_cast %59 : vector<8x256xf32> to vector<1x8x256xf32>
    %61 = vector.broadcast %57 : vector<4x1x256xf32> to vector<4x8x256xf32>
    %62 = vector.broadcast %60 : vector<1x8x256xf32> to vector<4x8x256xf32>
    %63 = arith.mulf %61, %62 : vector<4x8x256xf32>
    %64 = arith.mulf %48, %56 : vector<4x1x256xf32>
    %65 = vector.extract_strided_slice %13 {offsets = [1, 0, 0], sizes = [1, 8, 256], strides = [1, 1, 1]} : vector<4x8x256xf32> to vector<1x8x256xf32>
    %66 = vector.shape_cast %65 : vector<1x8x256xf32> to vector<8x256xf32>
    %67 = vector.shape_cast %66 : vector<8x256xf32> to vector<1x8x256xf32>
    %68 = vector.broadcast %64 : vector<4x1x256xf32> to vector<4x8x256xf32>
    %69 = vector.broadcast %67 : vector<1x8x256xf32> to vector<4x8x256xf32>
    %70 = arith.mulf %68, %69 : vector<4x8x256xf32>
    %71 = arith.addf %63, %70 : vector<4x8x256xf32>
    %72 = arith.mulf %50, %56 : vector<4x1x256xf32>
    %73 = vector.extract_strided_slice %13 {offsets = [2, 0, 0], sizes = [1, 8, 256], strides = [1, 1, 1]} : vector<4x8x256xf32> to vector<1x8x256xf32>
    %74 = vector.shape_cast %73 : vector<1x8x256xf32> to vector<8x256xf32>
    %75 = vector.shape_cast %74 : vector<8x256xf32> to vector<1x8x256xf32>
    %76 = vector.broadcast %72 : vector<4x1x256xf32> to vector<4x8x256xf32>
    %77 = vector.broadcast %75 : vector<1x8x256xf32> to vector<4x8x256xf32>
    %78 = arith.mulf %76, %77 : vector<4x8x256xf32>
    %79 = arith.addf %71, %78 : vector<4x8x256xf32>
    %80 = arith.mulf %52, %56 : vector<4x1x256xf32>
    %81 = vector.extract_strided_slice %13 {offsets = [3, 0, 0], sizes = [1, 8, 256], strides = [1, 1, 1]} : vector<4x8x256xf32> to vector<1x8x256xf32>
    %82 = vector.shape_cast %81 : vector<1x8x256xf32> to vector<8x256xf32>
    %83 = vector.shape_cast %82 : vector<8x256xf32> to vector<1x8x256xf32>
    %84 = vector.broadcast %80 : vector<4x1x256xf32> to vector<4x8x256xf32>
    %85 = vector.broadcast %83 : vector<1x8x256xf32> to vector<4x8x256xf32>
    %86 = arith.mulf %84, %85 : vector<4x8x256xf32>
    %87 = arith.addf %79, %86 : vector<4x8x256xf32>
    %88 = vector.shape_cast %87 : vector<4x8x256xf32> to vector<32x256xf32>
    %c0_10 = arith.constant 0 : index
    %c0_11 = arith.constant 0 : index
    %89 = vector.load %arg5[%c0_10, %c0_11] : memref<32x32xbf16, #tpu.memory_space<vmem>>, vector<32x32xbf16>
    %90 = arith.truncf %88 : vector<32x256xf32> to vector<32x256xbf16>
    %cst_12 = arith.constant dense<0.000000e+00> : vector<32x256xf32>
    %91 = tpu.matmul %89, %90, %cst_12 {dimension_numbers = #tpu.dot_dimension_numbers<[1], [0], [0], [1], [0, 0, 1, 1], [], []>} : vector<32x32xbf16>, vector<32x256xbf16>, vector<32x256xf32> -> vector<32x256xf32>
    %c0_13 = arith.constant 0 : index
    %c0_14 = arith.constant 0 : index
    %92 = vector.load %arg6[%c0_13, %c0_14] : memref<32x1xf32, #tpu.memory_space<vmem>>, vector<32x1xf32>
    %93 = vector.broadcast %92 : vector<32x1xf32> to vector<32x256xf32>
    %94 = arith.addf %91, %93 : vector<32x256xf32>
    %c0_15 = arith.constant 0 : index
    %c0_16 = arith.constant 0 : index
    %c0_17 = arith.constant 0 : index
    %95 = vector.load %arg7[%c0_15, %c0_16, %c0_17] : memref<1x32x256xf32, #tpu.memory_space<vmem>>, vector<1x32x256xf32>
    %96 = vector.shape_cast %95 : vector<1x32x256xf32> to vector<32x256xf32>
    %97 = vector.shape_cast %94 : vector<32x256xf32> to vector<1x32x256xf32>
    tpu.vector_store %arg7[%c0_15, %c0_16, %c0_17], %97 {strides = array<i32>} : memref<1x32x256xf32, #tpu.memory_space<vmem>>, vector<1x32x256xf32>,
    return
  }
  func.func @transform_0(%arg0: i32, %arg1: i32) -> (i32, i32, i32) {
    %c0_i32 = arith.constant 0 : i32
    %c0_i32_0 = arith.constant 0 : i32
    return %arg0, %c0_i32, %arg1 : i32, i32, i32
  }
  func.func @transform_1(%arg0: i32, %arg1: i32) -> (i32, i32) {
    %c0_i32 = arith.constant 0 : i32
    %c0_i32_0 = arith.constant 0 : i32
    %c0_i32_1 = arith.constant 0 : i32
    return %c0_i32, %c0_i32_0 : i32, i32
  }
  func.func @transform_2(%arg0: i32, %arg1: i32) -> (i32, i32) {
    %c0_i32 = arith.constant 0 : i32
    %c0_i32_0 = arith.constant 0 : i32
    %c0_i32_1 = arith.constant 0 : i32
    return %c0_i32, %c0_i32_0 : i32, i32
  }
  func.func @transform_3(%arg0: i32, %arg1: i32) -> (i32, i32) {
    %c0_i32 = arith.constant 0 : i32
    %c0_i32_0 = arith.constant 0 : i32
    %c0_i32_1 = arith.constant 0 : i32
    return %c0_i32, %c0_i32_0 : i32, i32
  }
  func.func @transform_4(%arg0: i32, %arg1: i32) -> (i32, i32) {
    %c0_i32 = arith.constant 0 : i32
    %c0_i32_0 = arith.constant 0 : i32
    %c0_i32_1 = arith.constant 0 : i32
    return %c0_i32, %c0_i32_0 : i32, i32
  }
  func.func @transform_5(%arg0: i32, %arg1: i32) -> (i32, i32, i32) {
    %c0_i32 = arith.constant 0 : i32
    %c0_i32_0 = arith.constant 0 : i32
    return %arg0, %c0_i32, %arg1 : i32, i32, i32
  }
}

module attributes {stable_mosaic.version = 11 : i64} {
  func.func @mha_kernel(%arg0: i32, %arg1: i32, %arg2: memref<1x32x256xf32, #tpu.memory_space<vmem>>, %arg3: memref<96x32xbf16, #tpu.memory_space<vmem>>, %arg4: memref<96x1xf32, #tpu.memory_space<vmem>>, %arg5: memref<32x32xbf16, #tpu.memory_space<vmem>>, %arg6: memref<32x1xf32, #tpu.memory_space<vmem>>, %arg7: memref<1x32x256xf32, #tpu.memory_space<vmem>>) attributes {dimension_semantics = [#tpu.dimension_semantics<parallel>, #tpu.dimension_semantics<parallel>], iteration_bounds = array<i64: 2, 1>, scalar_prefetch = 0 : i64, scratch_operands = 0 : i64, tpu.core_type = #tpu.core_type<tc>, window_params = [{transform_indices = @transform_0, window_bounds = array<i64: 1, 32, 256>}, {pipeline_mode = #tpu.pipeline_mode<synchronous>, transform_indices = @transform_1, window_bounds = array<i64: 96, 32>}, {pipeline_mode = #tpu.pipeline_mode<synchronous>, transform_indices = @transform_2, window_bounds = array<i64: 96, 1>}, {pipeline_mode = #tpu.pipeline_mode<synchronous>, transform_indices = @transform_3, window_bounds = array<i64: 32, 32>}, {pipeline_mode = #tpu.pipeline_mode<synchronous>, transform_indices = @transform_4, window_bounds = array<i64: 32, 1>}, {transform_indices = @transform_5, window_bounds = array<i64: 1, 32, 256>}]} {
    %c0 = arith.constant 0 : index
    %c0_0 = arith.constant 0 : index
    %c0_1 = arith.constant 0 : index
    %0 = vector.load %arg2[%c0, %c0_0, %c0_1] : memref<1x32x256xf32, #tpu.memory_space<vmem>>, vector<1x32x256xf32>
    %1 = vector.shape_cast %0 : vector<1x32x256xf32> to vector<32x256xf32>
    %c0_2 = arith.constant 0 : index
    %c0_3 = arith.constant 0 : index
    %2 = vector.load %arg3[%c0_2, %c0_3] : memref<96x32xbf16, #tpu.memory_space<vmem>>, vector<96x32xbf16>
    %3 = arith.truncf %1 : vector<32x256xf32> to vector<32x256xbf16>
    %cst = arith.constant dense<0.000000e+00> : vector<96x256xf32>
    %4 = tpu.matmul %2, %3, %cst {dimension_numbers = #tpu.dot_dimension_numbers<[1], [0], [0], [1], [0, 0, 1, 1], [], []>} : vector<96x32xbf16>, vector<32x256xbf16>, vector<96x256xf32> -> vector<96x256xf32>
    %c0_4 = arith.constant 0 : index
    %c0_5 = arith.constant 0 : index
    %5 = vector.load %arg4[%c0_4, %c0_5] : memref<96x1xf32, #tpu.memory_space<vmem>>, vector<96x1xf32>
    %6 = vector.broadcast %5 : vector<96x1xf32> to vector<96x256xf32>
    %7 = arith.addf %4, %6 : vector<96x256xf32>
    %8 = vector.extract_strided_slice %7 {offsets = [0, 0], sizes = [32, 256], strides = [1, 1]} : vector<96x256xf32> to vector<32x256xf32>
    %9 = vector.shape_cast %8 : vector<32x256xf32> to vector<4x8x256xf32>
    %10 = vector.extract_strided_slice %7 {offsets = [32, 0], sizes = [32, 256], strides = [1, 1]} : vector<96x256xf32> to vector<32x256xf32>
    %11 = vector.shape_cast %10 : vector<32x256xf32> to vector<4x8x256xf32>
    %12 = vector.extract_strided_slice %7 {offsets = [64, 0], sizes = [32, 256], strides = [1, 1]} : vector<96x256xf32> to vector<32x256xf32>
    %13 = vector.shape_cast %12 : vector<32x256xf32> to vector<4x8x256xf32>
    %14 = vector.extract_strided_slice %11 {offsets = [0, 0, 0], sizes = [1, 8, 256], strides = [1, 1, 1]} : vector<4x8x256xf32> to vector<1x8x256xf32>
    %15 = vector.shape_cast %14 : vector<1x8x256xf32> to vector<8x256xf32>
    %16 = vector.shape_cast %15 : vector<8x256xf32> to vector<1x8x256xf32>
    %17 = vector.broadcast %16 : vector<1x8x256xf32> to vector<4x8x256xf32>
    %18 = arith.mulf %9, %17 : vector<4x8x256xf32>
    %cst_6 = arith.constant dense<0.000000e+00> : vector<4x256xf32>
    %19 = vector.multi_reduction <add>, %18, %cst_6 [1] : vector<4x8x256xf32> to vector<4x256xf32>
    %20 = vector.shape_cast %19 : vector<4x256xf32> to vector<4x1x256xf32>
    %21 = vector.extract_strided_slice %11 {offsets = [1, 0, 0], sizes = [1, 8, 256], strides = [1, 1, 1]} : vector<4x8x256xf32> to vector<1x8x256xf32>
    %22 = vector.shape_cast %21 : vector<1x8x256xf32> to vector<8x256xf32>
    %23 = vector.shape_cast %22 : vector<8x256xf32> to vector<1x8x256xf32>
    %24 = vector.broadcast %23 : vector<1x8x256xf32> to vector<4x8x256xf32>
    %25 = arith.mulf %9, %24 : vector<4x8x256xf32>
    %cst_7 = arith.constant dense<0.000000e+00> : vector<4x256xf32>
    %26 = vector.multi_reduction <add>, %25, %cst_7 [1] : vector<4x8x256xf32> to vector<4x256xf32>
    %27 = vector.shape_cast %26 : vector<4x256xf32> to vector<4x1x256xf32>
    %28 = vector.extract_strided_slice %11 {offsets = [2, 0, 0], sizes = [1, 8, 256], strides = [1, 1, 1]} : vector<4x8x256xf32> to vector<1x8x256xf32>
    %29 = vector.shape_cast %28 : vector<1x8x256xf32> to vector<8x256xf32>
    %30 = vector.shape_cast %29 : vector<8x256xf32> to vector<1x8x256xf32>
    %31 = vector.broadcast %30 : vector<1x8x256xf32> to vector<4x8x256xf32>
    %32 = arith.mulf %9, %31 : vector<4x8x256xf32>
    %cst_8 = arith.constant dense<0.000000e+00> : vector<4x256xf32>
    %33 = vector.multi_reduction <add>, %32, %cst_8 [1] : vector<4x8x256xf32> to vector<4x256xf32>
    %34 = vector.shape_cast %33 : vector<4x256xf32> to vector<4x1x256xf32>
    %35 = vector.extract_strided_slice %11 {offsets = [3, 0, 0], sizes = [1, 8, 256], strides = [1, 1, 1]} : vector<4x8x256xf32> to vector<1x8x256xf32>
    %36 = vector.shape_cast %35 : vector<1x8x256xf32> to vector<8x256xf32>
    %37 = vector.shape_cast %36 : vector<8x256xf32> to vector<1x8x256xf32>
    %38 = vector.broadcast %37 : vector<1x8x256xf32> to vector<4x8x256xf32>
    %39 = arith.mulf %9, %38 : vector<4x8x256xf32>
    %cst_9 = arith.constant dense<0.000000e+00> : vector<4x256xf32>
    %40 = vector.multi_reduction <add>, %39, %cst_9 [1] : vector<4x8x256xf32> to vector<4x256xf32>
    %41 = vector.shape_cast %40 : vector<4x256xf32> to vector<4x1x256xf32>
    %42 = arith.maximumf %20, %27 : vector<4x1x256xf32>
    %43 = arith.maximumf %42, %34 : vector<4x1x256xf32>
    %44 = arith.maximumf %43, %41 : vector<4x1x256xf32>
    %45 = arith.subf %20, %44 : vector<4x1x256xf32>
    %46 = math.exp %45 : vector<4x1x256xf32>
    %47 = arith.subf %27, %44 : vector<4x1x256xf32>
    %48 = math.exp %47 : vector<4x1x256xf32>
    %49 = arith.subf %34, %44 : vector<4x1x256xf32>
    %50 = math.exp %49 : vector<4x1x256xf32>
    %51 = arith.subf %41, %44 : vector<4x1x256xf32>
    %52 = math.exp %51 : vector<4x1x256xf32>
    %53 = arith.addf %46, %48 : vector<4x1x256xf32>
    %54 = arith.addf %53, %50 : vector<4x1x256xf32>
    %55 = arith.addf %54, %52 : vector<4x1x256xf32>
    %56 = tpu.reciprocal %55 {approx = true} : vector<4x1x256xf32> -> vector<4x1x256xf32>
    %57 = arith.mulf %46, %56 : vector<4x1x256xf32>
    %58 = vector.extract_strided_slice %13 {offsets = [0, 0, 0], sizes = [1, 8, 256], strides = [1, 1, 1]} : vector<4x8x256xf32> to vector<1x8x256xf32>
    %59 = vector.shape_cast %58 : vector<1x8x256xf32> to vector<8x256xf32>
    %60 = vector.shape_cast %59 : vector<8x256xf32> to vector<1x8x256xf32>
    %61 = vector.broadcast %57 : vector<4x1x256xf32> to vector<4x8x256xf32>
    %62 = vector.broadcast %60 : vector<1x8x256xf32> to vector<4x8x256xf32>
    %63 = arith.mulf %61, %62 : vector<4x8x256xf32>
    %64 = arith.mulf %48, %56 : vector<4x1x256xf32>
    %65 = vector.extract_strided_slice %13 {offsets = [1, 0, 0], sizes = [1, 8, 256], strides = [1, 1, 1]} : vector<4x8x256xf32> to vector<1x8x256xf32>
    %66 = vector.shape_cast %65 : vector<1x8x256xf32> to vector<8x256xf32>
    %67 = vector.shape_cast %66 : vector<8x256xf32> to vector<1x8x256xf32>
    %68 = vector.broadcast %64 : vector<4x1x256xf32> to vector<4x8x256xf32>
    %69 = vector.broadcast %67 : vector<1x8x256xf32> to vector<4x8x256xf32>
    %70 = arith.mulf %68, %69 : vector<4x8x256xf32>
    %71 = arith.addf %63, %70 : vector<4x8x256xf32>
    %72 = arith.mulf %50, %56 : vector<4x1x256xf32>
    %73 = vector.extract_strided_slice %13 {offsets = [2, 0, 0], sizes = [1, 8, 256], strides = [1, 1, 1]} : vector<4x8x256xf32> to vector<1x8x256xf32>
    %74 = vector.shape_cast %73 : vector<1x8x256xf32> to vector<8x256xf32>
    %75 = vector.shape_cast %74 : vector<8x256xf32> to vector<1x8x256xf32>
    %76 = vector.broadcast %72 : vector<4x1x256xf32> to vector<4x8x256xf32>
    %77 = vector.broadcast %75 : vector<1x8x256xf32> to vector<4x8x256xf32>
    %78 = arith.mulf %76, %77 : vector<4x8x256xf32>
    %79 = arith.addf %71, %78 : vector<4x8x256xf32>
    %80 = arith.mulf %52, %56 : vector<4x1x256xf32>
    %81 = vector.extract_strided_slice %13 {offsets = [3, 0, 0], sizes = [1, 8, 256], strides = [1, 1, 1]} : vector<4x8x256xf32> to vector<1x8x256xf32>
    %82 = vector.shape_cast %81 : vector<1x8x256xf32> to vector<8x256xf32>
    %83 = vector.shape_cast %82 : vector<8x256xf32> to vector<1x8x256xf32>
    %84 = vector.broadcast %80 : vector<4x1x256xf32> to vector<4x8x256xf32>
    %85 = vector.broadcast %83 : vector<1x8x256xf32> to vector<4x8x256xf32>
    %86 = arith.mulf %84, %85 : vector<4x8x256xf32>
    %87 = arith.addf %79, %86 : vector<4x8x256xf32>
    %88 = vector.shape_cast %87 : vector<4x8x256xf32> to vector<32x256xf32>
    %c0_10 = arith.constant 0 : index
    %c0_11 = arith.constant 0 : index
    %89 = vector.load %arg5[%c0_10, %c0_11] : memref<32x32xbf16, #tpu.memory_space<vmem>>, vector<32x32xbf16>
    %90 = arith.truncf %88 : vector<32x256xf32> to vector<32x256xbf16>
    %cst_12 = arith.constant dense<0.000000e+00> : vector<32x256xf32>
    %91 = tpu.matmul %89, %90, %cst_12 {dimension_numbers = #tpu.dot_dimension_numbers<[1], [0], [0], [1], [0, 0, 1, 1], [], []>} : vector<32x32xbf16>, vector<32x256xbf16>, vector<32x256xf32> -> vector<32x256xf32>
    %c0_13 = arith.constant 0 : index
    %c0_14 = arith.constant 0 : index
    %92 = vector.load %arg6[%c0_13, %c0_14] : memref<32x1xf32, #tpu.memory_space<vmem>>, vector<32x1xf32>
    %93 = vector.broadcast %92 : vector<32x1xf32> to vector<32x256xf32>
    %94 = arith.addf %91, %93 : vector<32x256xf32>
    %c0_15 = arith.constant 0 : index
    %c0_16 = arith.constant 0 : index
    %c0_17 = arith.constant 0 : index
    %95 = vector.load %arg7[%c0_15, %c0_16, %c0_17] : memref<1x32x256xf32, #tpu.memory_space<vmem>>, vector<1x32x256xf32>
    %96 = vector.shape_cast %95 : vector<1x32x256xf32> to vector<32x256xf32>
    %97 = vector.shape_cast %94 : vector<32x256xf32> to vector<1x32x256xf32>
    tpu.vector_store %arg7[%c0_15, %c0_16, %c0_17], %97 {strides = array<i32>} : memref<1x32x256xf32, #tpu.memory_space<vmem>>, vector<1x32x256xf32>,
    return
  }
  func.func @transform_0(%arg0: i32, %arg1: i32) -> (i32, i32, i32) {
    %c0_i32 = arith.constant 0 : i32
    %c0_i32_0 = arith.constant 0 : i32
    return %arg0, %c0_i32, %arg1 : i32, i32, i32
  }
  func.func @transform_1(%arg0: i32, %arg1: i32) -> (i32, i32) {
    %c0_i32 = arith.constant 0 : i32
    %c0_i32_0 = arith.constant 0 : i32
    %c0_i32_1 = arith.constant 0 : i32
    return %c0_i32, %c0_i32_0 : i32, i32
  }
  func.func @transform_2(%arg0: i32, %arg1: i32) -> (i32, i32) {
    %c0_i32 = arith.constant 0 : i32
    %c0_i32_0 = arith.constant 0 : i32
    %c0_i32_1 = arith.constant 0 : i32
    return %c0_i32, %c0_i32_0 : i32, i32
  }
  func.func @transform_3(%arg0: i32, %arg1: i32) -> (i32, i32) {
    %c0_i32 = arith.constant 0 : i32
    %c0_i32_0 = arith.constant 0 : i32
    %c0_i32_1 = arith.constant 0 : i32
    return %c0_i32, %c0_i32_0 : i32, i32
  }
  func.func @transform_4(%arg0: i32, %arg1: i32) -> (i32, i32) {
    %c0_i32 = arith.constant 0 : i32
    %c0_i32_0 = arith.constant 0 : i32
    %c0_i32_1 = arith.constant 0 : i32
    return %c0_i32, %c0_i32_0 : i32, i32
  }
  func.func @transform_5(%arg0: i32, %arg1: i32) -> (i32, i32, i32) {
    %c0_i32 = arith.constant 0 : i32
    %c0_i32_0 = arith.constant 0 : i32
    return %arg0, %c0_i32, %arg1 : i32, i32, i32
  }
}

</mosaic_0001>

<bundles_post_ra>
// kernel: tpu_custom_call.1
= control target key start
LH: loop header
LB: loop body
LE: loop exit
PB: predicated region body
PF: predicated region fallthrough
CT: control target
= control target key end

     0   :  { %10 = vsyncpa [#allocation3], 0  ;;  %s2050_s0 = inlined_call_operand.vmem [shape: f32[2,32,256], index: 0, kind: input, shape index: {}]   ;;  %s2051_s1 = inlined_call_operand.vmem [shape: bf16[96,32], index: 1, kind: input, shape index: {}]   ;;  %s2052_s2 = inlined_call_operand.vmem [shape: f32[96,1], index: 2, kind: input, shape index: {}]   ;;  %s2053_s3 = inlined_call_operand.vmem [shape: bf16[32,32], index: 3, kind: input, shape index: {}]   ;;  %s2054_s4 = inlined_call_operand.vmem [shape: f32[32,1], index: 4, kind: input, shape index: {}]   ;;  %s2055_s5 = inlined_call_operand.hbm [shape: f32[2,32,256], index: 5, kind: output, shape index: {}]  }
   0x1   :  { %12 = vsyncpa [#allocation3 + $0x1], 0  ;;  %s1456_s18 = smov 0   ;;  %s1458_s19 = smov 0  }
   0x2   :  { %s1460_s20 = smov 0   ;;  %s1462_s21 = smov 0  }
   0x3   :  { %s1464_s22 = smov 0   ;;  %s1466_s23 = smov 0  }
   0x4 LB: > { %s1161_s24 = sadd.s32 4294967295, %s1420_s23   ;;  %s1162_s25 = sadd.s32 4294967294, %s1420_s23   ;;  %s1420_s23 = sphi %s1466_s23, %s18_s23   ;;  %s1416_s22 = sphi %s1464_s22, %s2077_s22   ;;  %s1412_s21 = sphi %s1462_s21, %s2076_s21   ;;  %s1408_s20 = sphi %s1460_s20, %s2075_s20   ;;  %s1404_s19 = sphi %s1458_s19, %s2074_s19   ;;  %s1400_s18 = sphi %s1456_s18, %s2073_s18  }
   0x5   : > { %s30_s26 = sadd.s32 1, %s1416_s22  ;;  %s151_s27 = sadd.s32 1, %s1408_s20 }
   0x6   : > { %p32_p0 = scmp.ge.s32.totalorder %s30_s26, 2  ;;  %p161_p1 = scmp.ne.s32.totalorder %s1408_s20, %s1404_s19 }
   0x7   : > { %p162_p2 = scmp.eq.s32.totalorder %s1161_s24, 1  ;;  %p167_p3 = scmp.ne.s32.totalorder %s1404_s19, %s1400_s18 }
   0x8   : > { %s2079_s26 = smov (%p32_p0, %s30_s26), 0  ;;  %p168_p5 = scmp.eq.s32.totalorder %s1162_s25, 1 }
   0x9   : > { %p1496_p4 = por %p162_p2, %p161_p1  ;;  %s146_s29 = ssub.s32 %s1416_s22, %s2079_s26 }
   0xa   : > { %p1165_p6 = scmp.ge.s32.totalorder %s1420_s23, 1  ;;  %p149_p7 = scmp.eq.s32.totalorder %s146_s29, 0 }
   0xb   : > { %p1503_p8 = por %p168_p5, %p167_p3  ;;  %p211_p9 = scmp.lt.s32.totalorder %s1420_s23, 3 }
   0xc   : > { %s1509_s6 = scalar_select %p149_p7, %s1408_s20, %s151_s27  }
   0xd   : > { %p212_p10 = pnand %p1165_p6, %p211_p9 }
   0xf   : > { %215 = sbr.rel (%p212_p10) target bundleno = 620 (0x26c), region = 40 }
  0x14   : > { %p244_p11 = scmp.lt.s32.totalorder %s1412_s21, 1  ;;  %v2056_v0 = vmov 0   ;;  %v283_v12 = vld [vmem:[%s2052_s2 + $0x20] sm:$0xff]  ;;  %v281_v13 = vld [vmem:[%s2052_s2 + $0x10] sm:$0xff]  ;;  %v284_v17 = vld [vmem:[%s2052_s2 + $0x28] sm:$0xff]  ;;  %vm381_vm0 = vcmask 261120  }
  0x15   : > { %432 = vmatprep.mubr.bf16.mxu0 %v2056_v0  ;;  %472 = vmatprep.mubr.bf16.mxu1 %v2056_v0  ;;  %v1256_v15 = vld [vmem:[%s2051_s1] sm:$0xff]   ;;  %v282_v18 = vld [vmem:[%s2052_s2 + $0x18] sm:$0xff]  ;;  %v285_v20 = vld [vmem:[%s2052_s2 + $0x30] sm:$0xff]  ;;  %s240_s15 = sand.u32 1, %s1404_s19   ;;  %s1191_s24 = sshll.u32 %s1412_s21, 10 }
  0x16   : > { %s245_s7 = scalar_select %p244_p11, %s1412_s21, 1  ;;  %1255 = vset.pattern.permute.xlu1 %v2056_v0  ;;  %1254 = vset.pattern.permute.xlu0 %v2056_v0  ;;  %v1257_v16 = vld [vmem:[%s2051_s1 + $0x20] sm:$0xff]   ;;  %v1258_v21 = vld [vmem:[%s2051_s1 + $0x8] sm:$0xff]   ;;  %v286_v23 = vld [vmem:[%s2052_s2 + $0x38] sm:$0xff] }
  0x17   : > { %313 = vperm.xlu1 %1255, %v283_v12   ;;  %303 = vperm.xlu0 %1254, %v281_v13   ;;  %v279_v19 = vld [vmem:[%s2052_s2] sm:$0xff]  ;;  %v1259_v22 = vld [vmem:[%s2051_s1 + $0x28] sm:$0xff]   ;;  %v1260_v27 = vld [vmem:[%s2051_s1 + $0x10] sm:$0xff]   ;;  %s1166_s16 = sshll.u32 %s240_s15, 6  ;;  %s2005_s21 = scalar_lea.sflag [#allocation3], %s240_s15 }
  0x18   : > { %s1190_s8 = sshll.u32 %s245_s7, 6  ;;  %v280_v24 = vld [vmem:[%s2052_s2 + $0x8] sm:$0xff]  ;;  %v287_v26 = vld [vmem:[%s2052_s2 + $0x40] sm:$0xff]  ;;  %v290_v28 = vld [vmem:[%s2052_s2 + $0x58] sm:$0xff]  ;;  %s242_s17 = scalar_lea.vmem [#allocation2], %s1166_s16 }
  0x19   : > { %s251_s11 = scalar_lea.vmem %s2050_s0, %s1190_s8  ;;  %v288_v25 = vld [vmem:[%s2052_s2 + $0x48] sm:$0xff]  ;;  %v289_v29 = vld [vmem:[%s2052_s2 + $0x50] sm:$0xff]  ;;  %v965_v31 = vld [vmem:[%s2054_s4] sm:$0xff]  ;;  %s1082_s25 = sshll.u32 %s242_s17, 4  ;;  %s2001_s25 = int_to_ptr.vmem [resolvable:$true] %s1082_s25 }
  0x1a   : > { %v260_v1 = vld [vmem:[%s251_s11 + $0x28] sm:$0xff]  ;;  %v262_v2 = vld [vmem:[%s251_s11 + $0x38] sm:$0xff]  ;;  %v259_v3 = vld [vmem:[%s251_s11 + $0x20] sm:$0xff]  ;;  %s1999_s7 = scalar_lea.hbm %s2055_s5, %s1191_s24  ;;  %s1344_s8 = scalar_lea.vmem %s2001_s25, 1024 }
  0x1b   : > { %v278_v4 = vpack.c.bf16 %v262_v2, %v260_v1  ;;  %v261_v5 = vld [vmem:[%s251_s11 + $0x30] sm:$0xff]  ;;  %v256_v6 = vld [vmem:[%s251_s11 + $0x8] sm:$0xff]  ;;  %v258_v7 = vld [vmem:[%s251_s11 + $0x18] sm:$0xff]  ;;  %318 = vperm.xlu1 %1255, %v284_v17   ;;  %308 = vperm.xlu0 %1254, %v282_v18   ;;  %p1345_p12 = scmp.ne.s32.totalorder %s2001_s25, %s1344_s8  ;;  %s1423_s9 = smov [#allocation2]  }
  0x1c   : > { %v277_v8 = vpack.c.bf16 %v261_v5, %v259_v3  ;;  %v276_v9 = vpack.c.bf16 %v258_v7, %v256_v6  ;;  %v255_v10 = vld [vmem:[%s251_s11] sm:$0xff]  ;;  %v257_v11 = vld [vmem:[%s251_s11 + $0x10] sm:$0xff]  ;;  %v966_v30 = vld [vmem:[%s2054_s4 + $0x8] sm:$0xff]  ;;  %s1348_s10 = sshll.u32 %s1423_s9, 4  ;;  %s1349_s10 = int_to_ptr.vmem [resolvable:$false] %s1348_s10 }
  0x1d   : > { %412 = vmatprep.subr.bf16.mxu0 %v278_v4  ;;  %1192 = vmatprep.subr.bf16.mxu1 %v278_v4  ;;  %v275_v14 = vpack.c.bf16 %v257_v11, %v255_v10  ;;  %v1261_v32 = vld [vmem:[%s2051_s1 + $0x18] sm:$0xff]   ;;  %v967_v34 = vld [vmem:[%s2054_s4 + $0x10] sm:$0xff]  ;;  %p1346_p13 = pnand %p1345_p12, %p1496_p4  ;;  %s1350_s11 = scalar_lea.vmem %s1349_s10, 2048 }
  0x1e   : > { %413 = vmatpush1.bf16.msra.mxu0 %v277_v8  ;;  %1194 = vmatpush1.bf16.msra.mxu1 %v277_v8  ;;  %v968_v33 = vld [vmem:[%s2054_s4 + $0x18] sm:$0xff]  ;;  %p1351_p1 = scmp.lt.s32.totalorder %s2001_s25, %s1349_s10  ;;  %p1352_p2 = scmp.lt.s32.totalorder %s1350_s11, %s1344_s8 }
  0x1f   : > { %414 = vmatprep.subr.bf16.mxu0 %v276_v9  ;;  %1193 = vmatprep.subr.bf16.mxu1 %v276_v9  ;;  %p1347_p0 = pneg %p1346_p13 }
  0x20   : > { %293 = vperm.xlu1 %1255, %v279_v19   ;;  %323 = vperm.xlu0 %1254, %v285_v20   ;;  %p1353_p3 = por %p1352_p2, %p1351_p1 }
  0x22   : > { %415 = vmatpush1.bf16.msra.mxu0 %v275_v14  ;;  %1195 = vmatpush1.bf16.msra.mxu1 %v275_v14  ;;  %p1354_p5 = pnand %p1353_p3, %p1347_p0 }
  0x24   : > { %328 = vperm.xlu1 %1255, %v286_v23   ;;  %298 = vperm.xlu0 %1254, %v280_v24  }
  0x25   : > { %1175 = vmatmul.mubr.msk.bf16.vlgmr.msra.gmra.mxu0 %vm381_vm0, %v1256_v15  ;;  %1179 = vmatmul.mubr.msk.bf16.vlgmr.msra.gmra.mxu1 %vm381_vm0, %v1257_v16 }
  0x26   : > { %442 = vmatprep.mubr.bf16.mxu0 %v2056_v0  ;;  %482 = vmatprep.mubr.bf16.mxu1 %v2056_v0 }
  0x28   : > { %338 = vperm.xlu1 %1255, %v288_v25   ;;  %333 = vperm.xlu0 %1254, %v287_v26  }
  0x2c   : > { %348 = vperm.xlu1 %1255, %v290_v28   ;;  %343 = vperm.xlu0 %1254, %v289_v29  }
  0x2d   : > { %1176 = vmatmul.mubr.msk.bf16.gmra.mxu0 %vm381_vm0, %v1258_v21  ;;  %1180 = vmatmul.mubr.msk.bf16.gmra.mxu1 %vm381_vm0, %v1259_v22 }
  0x2e   : > { %452 = vmatprep.mubr.bf16.mxu0 %v2056_v0  ;;  %1037 = vmatprep.mubr.bf16.mxu1 %v2056_v0 }
  0x30   : > { %976 = vperm.xlu1 %1255, %v966_v30   ;;  %971 = vperm.xlu0 %1254, %v965_v31  }
  0x34   : > { %986 = vperm.xlu1 %1255, %v968_v33   ;;  %981 = vperm.xlu0 %1254, %v967_v34  }
  0x35   : > { %1177 = vmatmul.mubr.msk.bf16.gmra.mxu0 %vm381_vm0, %v1260_v27 }
  0x36   : > { %462 = vmatprep.mubr.bf16.mxu0 %v2056_v0 }
  0x3d   : > { %1178 = vmatmul.mubr.msk.bf16.gmra.mxu0 %vm381_vm0, %v1261_v32 }
  0x92   : > { %v304_v35 = vpop.permute.xlu0 %303  ;;  %v314_v38 = vpop.permute.xlu1 %313 }
  0x96   : > { %v309_v39 = vpop.permute.xlu0 %308  ;;  %v319_v43 = vpop.permute.xlu1 %318 }
  0x9b   : > { %v1597_v44 = vpop.permute.xlu0 %323  ;;  %v294_v48 = vpop.permute.xlu1 %293 }
  0x9f   : > { %v299_v50 = vpop.permute.xlu0 %298 }
  0xe5   : > { %v434_v36 = vpop.f32.mrf.mxu0 }
  0xe6   : > { %v1599_v49 = vadd.f32 %v434_v36, %v294_v48 }
  0xe7   : > { %v436_v37 = vpop.f32.mrf.mxu0 }
  0xe8   : > { %v1607_v56 = vadd.f32 %v436_v37, %v294_v48 }
  0xe9   : > { %v438_v40 = vpop.f32.mrf.mxu0 }
  0xea   : > { %v1601_v52 = vadd.f32 %v438_v40, %v299_v50 }
  0xeb   : > { %v440_v41 = vpop.f32.mrf.mxu0 }
  0xec   : > { %v1613_v62 = vadd.f32 %v440_v41, %v299_v50 }
  0xed   : > { %v444_v42 = vpop.f32.mrf.mxu0 }
  0xee   : > { %v1603_v53 = vadd.f32 %v444_v42, %v304_v35 }
  0xef   : > { %v446_v45 = vpop.f32.mrf.mxu0 }
  0xf0   : > { %v1615_v63 = vadd.f32 %v446_v45, %v304_v35 }
  0xf1   : > { %v448_v46 = vpop.f32.mrf.mxu0 }
  0xf2   : > { %v1605_v54 = vadd.f32 %v448_v46, %v309_v39 }
  0xf3   : > { %v450_v47 = vpop.f32.mrf.mxu0 }
  0xf4   : > { %v1617_v1 = vadd.f32 %v450_v47, %v309_v39 }
  0xf5   : > { %v454_v51 = vpop.f32.mrf.mxu0 }
  0xf6   : > { %v455_v55 = vadd.f32 %v454_v51, %v314_v38 }
  0xf7   : > { %v456_v57 = vpop.f32.mrf.mxu0 }
  0xf8   : > { %v493_v58 = vmul.f32 %v455_v55, %v1599_v49  ;;  %v495_v59 = vmul.f32 %v455_v55, %v1601_v52  ;;  %v497_v60 = vmul.f32 %v455_v55, %v1603_v53  ;;  %v499_v61 = vmul.f32 %v455_v55, %v1605_v54 }
  0xf9   : > { %v457_v2 = vadd.f32 %v456_v57, %v314_v38  ;;  %v458_v19 = vpop.f32.mrf.mxu0 }
  0xfa   : > { %v501_v3 = vrot.slane %v493_v58, 4  ;;  %v513_v4 = vrot.slane %v495_v59, 4  ;;  %v525_v5 = vrot.slane %v497_v60, 4  ;;  %v537_v6 = vrot.slane %v499_v61, 4 }
  0xfb   : > { %v494_v7 = vmul.f32 %v457_v2, %v1607_v56  ;;  %v496_v8 = vmul.f32 %v457_v2, %v1613_v62  ;;  %v498_v9 = vmul.f32 %v457_v2, %v1615_v63  ;;  %v500_v10 = vmul.f32 %v457_v2, %v1617_v1  ;;  %v460_v28 = vpop.f32.mrf.mxu0 }
  0xfc   : > { %v502_v11 = vadd.f32 %v501_v3, %v493_v58  ;;  %v514_v12 = vadd.f32 %v513_v4, %v495_v59  ;;  %v526_v13 = vadd.f32 %v525_v5, %v497_v60  ;;  %v538_v14 = vadd.f32 %v537_v6, %v499_v61 }
  0xfd   : > { %v507_v15 = vrot.slane %v494_v7, 4  ;;  %v519_v16 = vrot.slane %v496_v8, 4  ;;  %v531_v17 = vrot.slane %v498_v9, 4  ;;  %v543_v18 = vrot.slane %v500_v10, 4 }
  0xfe   : > { %v503_v20 = vrot.slane %v502_v11, 2  ;;  %v515_v21 = vrot.slane %v514_v12, 2  ;;  %v527_v22 = vrot.slane %v526_v13, 2  ;;  %v539_v23 = vrot.slane %v538_v14, 2 }
  0xff   : > { %v508_v24 = vadd.f32 %v507_v15, %v494_v7  ;;  %v520_v25 = vadd.f32 %v519_v16, %v496_v8  ;;  %v532_v26 = vadd.f32 %v531_v17, %v498_v9  ;;  %v544_v27 = vadd.f32 %v543_v18, %v500_v10  ;;  %v464_v9 = vpop.f32.mrf.mxu0 }
 0x100   : > { %v504_v29 = vadd.f32 %v503_v20, %v502_v11  ;;  %v516_v30 = vadd.f32 %v515_v21, %v514_v12  ;;  %v528_v31 = vadd.f32 %v527_v22, %v526_v13  ;;  %v540_v32 = vadd.f32 %v539_v23, %v538_v14 }
 0x101   : > { %v459_v33 = vadd.f32 %v458_v19, %v319_v43  ;;  %v461_v34 = vadd.f32 %v460_v28, %v319_v43  ;;  %v509_v35 = vrot.slane %v508_v24, 2  ;;  %v521_v36 = vrot.slane %v520_v25, 2 }
 0x102   : > { %v533_v37 = vrot.slane %v532_v26, 2  ;;  %v545_v38 = vrot.slane %v544_v27, 2  ;;  %v505_v61 = vrot.slane %v504_v29, 1  ;;  %v517_v2 = vrot.slane %v516_v30, 1 }
 0x103   : > { %v549_v39 = vmul.f32 %v459_v33, %v1599_v49  ;;  %v551_v40 = vmul.f32 %v459_v33, %v1601_v52  ;;  %v553_v41 = vmul.f32 %v459_v33, %v1603_v53  ;;  %v555_v42 = vmul.f32 %v459_v33, %v1605_v54 }
 0x104   : > { %v550_v45 = vmul.f32 %v461_v34, %v1607_v56  ;;  %v552_v46 = vmul.f32 %v461_v34, %v1613_v62  ;;  %v554_v47 = vmul.f32 %v461_v34, %v1615_v63  ;;  %v556_v43 = vmul.f32 %v461_v34, %v1617_v1 }
 0x105   : > { %v557_v48 = vrot.slane %v549_v39, 4  ;;  %v569_v50 = vrot.slane %v551_v40, 4  ;;  %v581_v51 = vrot.slane %v553_v41, 4  ;;  %v593_v55 = vrot.slane %v555_v42, 4 }
 0x106   : > { %v563_v57 = vrot.slane %v550_v45, 4  ;;  %v575_v58 = vrot.slane %v552_v46, 4  ;;  %v587_v59 = vrot.slane %v554_v47, 4  ;;  %v599_v60 = vrot.slane %v556_v43, 4 }
 0x107   : > { %v558_v3 = vadd.f32 %v557_v48, %v549_v39  ;;  %v570_v4 = vadd.f32 %v569_v50, %v551_v40  ;;  %v510_v5 = vadd.f32 %v509_v35, %v508_v24  ;;  %v522_v6 = vadd.f32 %v521_v36, %v520_v25 }
 0x108   : > { %v534_v7 = vadd.f32 %v533_v37, %v532_v26  ;;  %v546_v8 = vadd.f32 %v545_v38, %v544_v27  ;;  %v582_v10 = vadd.f32 %v581_v51, %v553_v41  ;;  %v594_v11 = vadd.f32 %v593_v55, %v555_v42  ;;  %v466_v26 = vpop.f32.mrf.mxu0 }
 0x109   : > { %v564_v12 = vadd.f32 %v563_v57, %v550_v45  ;;  %v576_v13 = vadd.f32 %v575_v58, %v552_v46  ;;  %v559_v14 = vrot.slane %v558_v3, 2  ;;  %v571_v15 = vrot.slane %v570_v4, 2 }
 0x10a   : > { %v588_v16 = vadd.f32 %v587_v59, %v554_v47  ;;  %v600_v17 = vadd.f32 %v599_v60, %v556_v43  ;;  %v1631_v18 = vadd.f32 %v505_v61, %v504_v29  ;;  %v1633_v19 = vadd.f32 %v517_v2, %v516_v30 }
 0x10b   : > { %v529_v20 = vrot.slane %v528_v31, 1  ;;  %v541_v21 = vrot.slane %v540_v32, 1  ;;  %v511_v22 = vrot.slane %v510_v5, 1  ;;  %v523_v23 = vrot.slane %v522_v6, 1 }
 0x10c   : > { %v535_v24 = vrot.slane %v534_v7, 1  ;;  %v547_v25 = vrot.slane %v546_v8, 1  ;;  %v583_v27 = vrot.slane %v582_v10, 2  ;;  %v595_v28 = vrot.slane %v594_v11, 2 }
 0x10d   : > { %v565_v33 = vrot.slane %v564_v12, 2  ;;  %v577_v34 = vrot.slane %v576_v13, 2  ;;  %v560_v35 = vadd.f32 %v559_v14, %v558_v3  ;;  %v572_v36 = vadd.f32 %v571_v15, %v570_v4 }
 0x10e   : > { %v589_v37 = vrot.slane %v588_v16, 2  ;;  %v601_v38 = vrot.slane %v600_v17, 2  ;;  %v1635_v39 = vadd.f32 %v529_v20, %v528_v31  ;;  %v1637_v29 = vadd.f32 %v541_v21, %v540_v32 }
 0x10f   : > { %v465_v30 = vadd.f32 %v464_v9, %v1597_v44  ;;  %v467_v40 = vadd.f32 %v466_v26, %v1597_v44  ;;  %v1641_v41 = vadd.f32 %v511_v22, %v510_v5  ;;  %v1643_v42 = vadd.f32 %v523_v23, %v522_v6 }
 0x110   : > { %v1645_v45 = vadd.f32 %v535_v24, %v534_v7  ;;  %v1647_v46 = vadd.f32 %v547_v25, %v546_v8  ;;  %v584_v47 = vadd.f32 %v583_v27, %v582_v10  ;;  %v596_v43 = vadd.f32 %v595_v28, %v594_v11 }
 0x111   : > { %v566_v48 = vadd.f32 %v565_v33, %v564_v12  ;;  %v578_v50 = vadd.f32 %v577_v34, %v576_v13  ;;  %v561_v31 = vrot.slane %v560_v35, 1  ;;  %v573_v51 = vrot.slane %v572_v36, 1 }
 0x112   : > { %v590_v32 = vadd.f32 %v589_v37, %v588_v16  ;;  %v602_v55 = vadd.f32 %v601_v38, %v600_v17  ;;  %v605_v57 = vmul.f32 %v465_v30, %v1599_v49  ;;  %v607_v44 = vmul.f32 %v465_v30, %v1601_v52 }
 0x113   : > { %v609_v58 = vmul.f32 %v465_v30, %v1603_v53  ;;  %v611_v59 = vmul.f32 %v465_v30, %v1605_v54  ;;  %v606_v60 = vmul.f32 %v467_v40, %v1607_v56  ;;  %v608_v61 = vmul.f32 %v467_v40, %v1613_v62 }
 0x114   : > { %v610_v2 = vmul.f32 %v467_v40, %v1615_v63  ;;  %v612_v3 = vmul.f32 %v467_v40, %v1617_v1  ;;  %v613_v4 = vrot.slane %v605_v57, 4  ;;  %v625_v5 = vrot.slane %v607_v44, 4 }
 0x115   : > { %v637_v6 = vrot.slane %v609_v58, 4  ;;  %v649_v7 = vrot.slane %v611_v59, 4  ;;  %v619_v8 = vrot.slane %v606_v60, 4  ;;  %v631_v9 = vrot.slane %v608_v61, 4 }
 0x116   : > { %v643_v10 = vrot.slane %v610_v2, 4  ;;  %v655_v11 = vrot.slane %v612_v3, 4  ;;  %v614_v12 = vadd.f32 %v613_v4, %v605_v57  ;;  %v626_v13 = vadd.f32 %v625_v5, %v607_v44 }
 0x117   : > { %v638_v14 = vadd.f32 %v637_v6, %v609_v58  ;;  %v650_v15 = vadd.f32 %v649_v7, %v611_v59  ;;  %v620_v16 = vadd.f32 %v619_v8, %v606_v60  ;;  %v632_v17 = vadd.f32 %v631_v9, %v608_v61  ;;  %v468_v59 = vpop.f32.mrf.mxu0 }
 0x118   : > { %v644_v20 = vadd.f32 %v643_v10, %v610_v2  ;;  %v656_v21 = vadd.f32 %v655_v11, %v612_v3  ;;  %v585_v22 = vrot.slane %v584_v47, 1  ;;  %v597_v23 = vrot.slane %v596_v43, 1  ;;  %v329_v11 = vpop.permute.xlu1 %328 }
 0x119   : > { %v567_v24 = vrot.slane %v566_v48, 1  ;;  %v615_v25 = vrot.slane %v614_v12, 2  ;;  %v579_v26 = vrot.slane %v578_v50, 1  ;;  %v591_v27 = vrot.slane %v590_v32, 1 }
 0x11a   : > { %v627_v28 = vrot.slane %v626_v13, 2  ;;  %v639_v33 = vrot.slane %v638_v14, 2  ;;  %v1657_v34 = vadd.f32 %v561_v31, %v560_v35  ;;  %v603_v37 = vrot.slane %v602_v55, 1 }
 0x11b   : > { %v651_v38 = vrot.slane %v650_v15, 2  ;;  %v621_v30 = vrot.slane %v620_v16, 2  ;;  %v616_v40 = vadd.f32 %v615_v25, %v614_v12  ;;  %v633_v57 = vrot.slane %v632_v17, 2 }
 0x11c   : > { %v645_v44 = vrot.slane %v644_v20, 2  ;;  %v657_v58 = vrot.slane %v656_v21, 2  ;;  %v1659_v60 = vadd.f32 %v573_v51, %v572_v36  ;;  %v1661_v61 = vadd.f32 %v585_v22, %v584_v47 }
 0x11d   : > { %v1663_v2 = vadd.f32 %v597_v23, %v596_v43  ;;  %v1665_v3 = vadd.f32 %v567_v24, %v566_v48  ;;  %v1667_v4 = vadd.f32 %v579_v26, %v578_v50  ;;  %v1669_v35 = vadd.f32 %v591_v27, %v590_v32  ;;  %v470_v50 = vpop.f32.mrf.mxu0 }
 0x11e   : > { %2063 = vst [vmem:[#allocation5_spill] sm:$0xff] %v1659_v60  ;;  %v628_v31 = vadd.f32 %v627_v28, %v626_v13  ;;  %v640_v5 = vadd.f32 %v639_v33, %v638_v14  ;;  %v717_v6 = vmax.f32 %v1631_v18, %v1657_v34  ;;  %v1673_v7 = vadd.f32 %v603_v37, %v602_v55 }
 0x11f   : > { %2064 = vst [vmem:[#allocation6_spill] sm:$0xff] %v1663_v2  ;;  %2065 = vst [vmem:[#allocation7_spill] sm:$0xff] %v1669_v35  ;;  %v652_v8 = vadd.f32 %v651_v38, %v650_v15  ;;  %v622_v36 = vadd.f32 %v621_v30, %v620_v16  ;;  %v617_v51 = vrot.slane %v616_v40, 1  ;;  %v1675_v47 = vadd.f32 %v633_v57, %v632_v17 }
 0x120   : > { %v1677_v43 = vadd.f32 %v645_v44, %v644_v20  ;;  %v1679_v48 = vadd.f32 %v657_v58, %v656_v21  ;;  %v719_v32 = vmax.f32 %v1633_v19, %v1659_v60  ;;  %v721_v9 = vmax.f32 %v1635_v39, %v1661_v61 }
 0x121   : > { %v723_v55 = vmax.f32 %v1637_v29, %v1663_v2  ;;  %v629_v14 = vrot.slane %v628_v31, 1  ;;  %v641_v15 = vrot.slane %v640_v5, 1  ;;  %v653_v16 = vrot.slane %v652_v8, 1 }
 0x122   : > { %v623_v17 = vrot.slane %v622_v36, 1  ;;  %v469_v20 = vadd.f32 %v468_v59, %v329_v11  ;;  %v471_v21 = vadd.f32 %v470_v50, %v329_v11  ;;  %v1693_v22 = vadd.f32 %v617_v51, %v616_v40 }
 0x123   : > { %v635_v23 = vrot.slane %v1675_v47, 1  ;;  %v647_v24 = vrot.slane %v1677_v43, 1  ;;  %v659_v25 = vrot.slane %v1679_v48, 1  ;;  %v1710_v10 = vadd.f32 %v653_v16, %v652_v8 }
 0x124   : > { %v661_v26 = vmul.f32 %v469_v20, %v1599_v49  ;;  %v663_v27 = vmul.f32 %v469_v20, %v1601_v52  ;;  %v665_v28 = vmul.f32 %v469_v20, %v1603_v53  ;;  %v667_v33 = vmul.f32 %v469_v20, %v1605_v54 }
 0x125   : > { %v662_v37 = vmul.f32 %v471_v21, %v1607_v56  ;;  %v664_v38 = vmul.f32 %v471_v21, %v1613_v62  ;;  %v666_v30 = vmul.f32 %v471_v21, %v1615_v63  ;;  %v668_v40 = vmul.f32 %v471_v21, %v1617_v1 }
 0x126   : > { %v669_v57 = vrot.slane %v661_v26, 4  ;;  %v681_v44 = vrot.slane %v663_v27, 4  ;;  %v693_v58 = vrot.slane %v665_v28, 4  ;;  %v705_v59 = vrot.slane %v667_v33, 4 }
 0x127   : > { %v675_v51 = vrot.slane %v662_v37, 4  ;;  %v687_v49 = vrot.slane %v664_v38, 4  ;;  %v699_v50 = vrot.slane %v666_v30, 4  ;;  %v711_v52 = vrot.slane %v668_v40, 4 }
 0x128   : > { %v670_v11 = vadd.f32 %v669_v57, %v661_v26  ;;  %v682_v53 = vadd.f32 %v681_v44, %v663_v27  ;;  %v694_v0 = vadd.f32 %v693_v58, %v665_v28  ;;  %v706_v54 = vadd.f32 %v705_v59, %v667_v33 }
 0x129   : > { %v1706_v20 = vadd.f32 %v629_v14, %v628_v31  ;;  %v1708_v56 = vadd.f32 %v641_v15, %v640_v5  ;;  %v676_v62 = vadd.f32 %v675_v51, %v662_v37  ;;  %v688_v63 = vadd.f32 %v687_v49, %v664_v38 }
 0x12a   : > { %v671_v13 = vrot.slane %v670_v11, 2  ;;  %v683_v1 = vrot.slane %v682_v53, 2  ;;  %v695_v21 = vrot.slane %v694_v0, 2  ;;  %v707_v12 = vrot.slane %v706_v54, 2 }
 0x12b   : > { %v1712_v60 = vadd.f32 %v623_v17, %v622_v36  ;;  %v700_v2 = vadd.f32 %v699_v50, %v666_v30  ;;  %v712_v35 = vadd.f32 %v711_v52, %v668_v40  ;;  %v725_v31 = vmax.f32 %v717_v6, %v1693_v22 }
 0x12c   : > { %v672_v26 = vadd.f32 %v671_v13, %v670_v11  ;;  %v684_v27 = vadd.f32 %v683_v1, %v682_v53  ;;  %v696_v28 = vadd.f32 %v695_v21, %v694_v0  ;;  %v708_v33 = vadd.f32 %v707_v12, %v706_v54 }
 0x12d   : > { %v727_v5 = vmax.f32 %v719_v32, %v1706_v20  ;;  %v677_v14 = vrot.slane %v676_v62, 2  ;;  %v689_v15 = vrot.slane %v688_v63, 2  ;;  %v729_v8 = vmax.f32 %v721_v9, %v1708_v56 }
 0x12e   : > { %v673_v37 = vrot.slane %v672_v26, 1  ;;  %v685_v38 = vrot.slane %v684_v27, 1  ;;  %v697_v57 = vrot.slane %v696_v28, 1  ;;  %v709_v44 = vrot.slane %v708_v33, 1 }
 0x12f   : > { %v731_v36 = vmax.f32 %v723_v55, %v1710_v10  ;;  %v701_v16 = vrot.slane %v700_v2, 2  ;;  %v713_v17 = vrot.slane %v712_v35, 2  ;;  %v724_v32 = vmax.f32 %v1647_v46, %v1673_v7 }
 0x130   : > { %v1718_v13 = vadd.f32 %v673_v37, %v672_v26  ;;  %v1720_v0 = vadd.f32 %v685_v38, %v684_v27  ;;  %v1722_v12 = vadd.f32 %v697_v57, %v696_v28  ;;  %v1724_v6 = vadd.f32 %v709_v44, %v708_v33  ;;  %v2070_v27 = vld [vmem:[#allocation6_spill] sm:$0xff] }
 0x131   : > { %v1729_v30 = vadd.f32 %v635_v23, %v1675_v47  ;;  %v678_v40 = vadd.f32 %v677_v14, %v676_v62  ;;  %v690_v9 = vadd.f32 %v689_v15, %v688_v63  ;;  %v1740_v49 = vadd.f32 %v647_v24, %v1677_v43 }
 0x132   : > { %v733_v55 = vmax.f32 %v725_v31, %v1718_v13  ;;  %v1733_v58 = vmax.f32 %v727_v5, %v1720_v0  ;;  %v737_v59 = vmax.f32 %v729_v8, %v1722_v12  ;;  %v1737_v51 = vmax.f32 %v731_v36, %v1724_v6 }
 0x133   : > { %v1743_v50 = vadd.f32 %v659_v25, %v1679_v48  ;;  %v2066_v47 = vmax.f32 %v1641_v41, %v1665_v3  ;;  %v702_v52 = vadd.f32 %v701_v16, %v700_v2  ;;  %v714_v62 = vadd.f32 %v713_v17, %v712_v35 }
 0x134   : > { %v741_v11 = vsub.f32 %v1631_v18, %v733_v55  ;;  %v743_v53 = vsub.f32 %v1633_v19, %v1733_v58  ;;  %v745_v54 = vsub.f32 %v1635_v39, %v737_v59  ;;  %v2067_v43 = vmax.f32 %v1643_v42, %v1667_v4  ;;  %v2068_v19 = vld [vmem:[#allocation7_spill] sm:$0xff] }
 0x135   : > { %v726_v23 = vmax.f32 %v2066_v47, %v1712_v60  ;;  %v747_v24 = vsub.f32 %v1637_v29, %v1737_v51  ;;  %v765_v25 = vsub.f32 %v1657_v34, %v733_v55  ;;  %v679_v63 = vrot.slane %v678_v40, 1 }
 0x136   : > { %v728_v48 = vmax.f32 %v2067_v43, %v1729_v30  ;;  %v749_v2 = vmul.f32 1.442695, %v741_v11  ;;  %v753_v1 = vmul.f32 1.442695, %v743_v53  ;;  %v769_v18 = vsub.f32 %v1661_v61, %v737_v59  ;;  %v2071_v61 = vld [vmem:[#allocation5_spill] sm:$0xff] }
 0x137   : > { %v691_v21 = vrot.slane %v690_v9, 1  ;;  %v2069_v39 = vmax.f32 %v1645_v45, %v2068_v19  ;;  %v757_v26 = vmul.f32 1.442695, %v745_v54  ;;  %v771_v28 = vsub.f32 %v2070_v27, %v1737_v51 }
 0x138   : > { %v703_v33 = vrot.slane %v702_v52, 1  ;;  %v732_v29 = vmax.f32 %v724_v32, %v1743_v50  ;;  %v773_v31 = vmul.f32 1.442695, %v765_v25  ;;  %v789_v34 = vsub.f32 %v1693_v22, %v733_v55 }
 0x139   : > { %v730_v35 = vmax.f32 %v2069_v39, %v1740_v49  ;;  %v715_v5 = vrot.slane %v714_v62, 1  ;;  %1264 = vpow2.f32 %v749_v2  ;;  %v761_v14 = vmul.f32 1.442695, %v747_v24 }
 0x13a   : > { %v767_v15 = vsub.f32 %v2071_v61, %v1733_v58  ;;  %v1771_v37 = vadd.f32 %v679_v63, %v678_v40  ;;  %1266 = vpow2.f32 %v753_v1  ;;  %v781_v38 = vmul.f32 1.442695, %v769_v18 }
 0x13b   : > { %v793_v57 = vsub.f32 %v1708_v56, %v737_v59  ;;  %v1774_v44 = vadd.f32 %v691_v21, %v690_v9  ;;  %1268 = vpow2.f32 %v757_v26  ;;  %v785_v8 = vmul.f32 1.442695, %v771_v28 }
 0x13c   : > { %v795_v36 = vsub.f32 %v1710_v10, %v1737_v51  ;;  %v1778_v22 = vadd.f32 %v703_v33, %v702_v52  ;;  %1270 = vpow2.f32 %v773_v31  ;;  %v797_v16 = vmul.f32 1.442695, %v789_v34 }
 0x13d   : > { %v813_v17 = vsub.f32 %v1718_v13, %v733_v55  ;;  %v1781_v32 = vadd.f32 %v715_v5, %v714_v62  ;;  %1272 = vpow2.f32 %v761_v14  ;;  %v777_v40 = vmul.f32 1.442695, %v767_v15 }
 0x13e   : > { %v791_v56 = vsub.f32 %v1706_v20, %v1733_v58  ;;  %v1786_v9 = vmax.f32 %v726_v23, %v1771_v37  ;;  %1274 = vpow2.f32 %v781_v38  ;;  %v805_v47 = vmul.f32 1.442695, %v793_v57 }
 0x13f   : > { %v817_v10 = vsub.f32 %v1722_v12, %v737_v59  ;;  %v1790_v52 = vmax.f32 %v728_v48, %v1774_v44  ;;  %1276 = vpow2.f32 %v785_v8  ;;  %v809_v11 = vmul.f32 1.442695, %v795_v36 }
 0x140   : > { %v819_v13 = vsub.f32 %v1724_v6, %v1737_v51  ;;  %v1795_v55 = vmax.f32 %v730_v35, %v1778_v22  ;;  %1278 = vpow2.f32 %v797_v16  ;;  %v815_v20 = vsub.f32 %v1720_v0, %v1733_v58 }
 0x141   : > { %v821_v23 = vmul.f32 1.442695, %v813_v17  ;;  %v1800_v53 = vmax.f32 %v732_v29, %v1781_v32  ;;  %1280 = vpow2.f32 %v777_v40  ;;  %v801_v12 = vmul.f32 1.442695, %v791_v56 }
 0x142   : > { %v742_v59 = vsub.f32 %v1641_v41, %v1786_v9  ;;  %1282 = vpow2.f32 %v805_v47  ;;  %v829_v54 = vmul.f32 1.442695, %v817_v10  ;;  %v744_v6 = vsub.f32 %v1643_v42, %v1790_v52 }
 0x143   : > { %1284 = vpow2.f32 %v809_v11  ;;  %v833_v51 = vmul.f32 1.442695, %v819_v13  ;;  %v746_v62 = vsub.f32 %v1645_v45, %v1795_v55  ;;  %v825_v0 = vmul.f32 1.442695, %v815_v20 }
 0x144   : > { %1286 = vpow2.f32 %v821_v23  ;;  %v748_v58 = vsub.f32 %v1647_v46, %v1800_v53  ;;  %v751_v43 = vmul.f32 1.442695, %v742_v59  ;;  %v766_v41 = vsub.f32 %v1665_v3, %v1786_v9 }
 0x145   : > { %1288 = vpow2.f32 %v801_v12  ;;  %v755_v24 = vmul.f32 1.442695, %v744_v6  ;;  %v768_v42 = vsub.f32 %v1667_v4, %v1790_v52  ;;  %v759_v45 = vmul.f32 1.442695, %v746_v62  ;;  %v474_v12 = vpop.f32.mrf.mxu1 }
 0x146   : > { %v1812_v48 = vpop.eup %1264  ;;  %1290 = vpow2.f32 %v829_v54  ;;  %v770_v63 = vsub.f32 %v2068_v19, %v1795_v55  ;;  %v763_v2 = vmul.f32 1.442695, %v748_v58  ;;  %v772_v3 = vsub.f32 %v1673_v7, %v1800_v53 }
 0x147   : > { %v1816_v25 = vpop.eup %1266  ;;  %1292 = vpow2.f32 %v833_v51  ;;  %v775_v18 = vmul.f32 1.442695, %v766_v41  ;;  %v790_v4 = vsub.f32 %v1712_v60, %v1786_v9  ;;  %v779_v19 = vmul.f32 1.442695, %v768_v42 }
 0x148   : > { %v1820_v46 = vpop.eup %1268  ;;  %1294 = vpow2.f32 %v825_v0  ;;  %v792_v35 = vsub.f32 %v1729_v30, %v1790_v52  ;;  %v783_v7 = vmul.f32 1.442695, %v770_v63  ;;  %v794_v27 = vsub.f32 %v1740_v49, %v1795_v55  ;;  %v1892_v0 = vpop.f32.mrf.mxu1 }
 0x149   : > { %v1824_v1 = vpop.eup %1270  ;;  %1296 = vpow2.f32 %v751_v43  ;;  %v787_v33 = vmul.f32 1.442695, %v772_v3  ;;  %v796_v29 = vsub.f32 %v1743_v50, %v1800_v53  ;;  %v799_v34 = vmul.f32 1.442695, %v790_v4 }
 0x14a   : > { %v1828_v21 = vpop.eup %1272  ;;  %v837_v39 = vadd.f32 %v1824_v1, %v1812_v48  ;;  %1298 = vpow2.f32 %v755_v24  ;;  %v803_v14 = vmul.f32 1.442695, %v792_v35  ;;  %v807_v15 = vmul.f32 1.442695, %v794_v27  ;;  %v478_v42 = vpop.f32.mrf.mxu1 }
 0x14b   : > { %v1834_v26 = vpop.eup %1274  ;;  %1300 = vpow2.f32 %v759_v45  ;;  %v811_v57 = vmul.f32 1.442695, %v796_v29  ;;  %v814_v8 = vsub.f32 %v1771_v37, %v1786_v9  ;;  %v816_v40 = vsub.f32 %v1774_v44, %v1790_v52 }
 0x14c   : > { %v1838_v28 = vpop.eup %1276  ;;  %v841_v60 = vadd.f32 %v1834_v26, %v1820_v46  ;;  %1302 = vpow2.f32 %v763_v2  ;;  %v818_v10 = vsub.f32 %v1778_v22, %v1795_v55  ;;  %v820_v9 = vsub.f32 %v1781_v32, %v1800_v53  ;;  %v1918_v35 = vpop.f32.mrf.mxu1 }
 0x14d   : > { %v1844_v31 = vpop.eup %1278  ;;  %v843_v30 = vadd.f32 %v1838_v28, %v1828_v21  ;;  %1304 = vpow2.f32 %v775_v18  ;;  %v823_v44 = vmul.f32 1.442695, %v814_v8  ;;  %v827_v22 = vmul.f32 1.442695, %v816_v40 }
 0x14e   : > { %v1848_v5 = vpop.eup %1280  ;;  %v845_v49 = vadd.f32 %v1844_v31, %v837_v39  ;;  %1306 = vpow2.f32 %v779_v19  ;;  %v831_v59 = vmul.f32 1.442695, %v818_v10  ;;  %v835_v53 = vmul.f32 1.442695, %v820_v9  ;;  %v484_v8 = vpop.f32.mrf.mxu1 }
 0x14f   : > { %v1851_v61 = vpop.eup %1282  ;;  %1308 = vpow2.f32 %v783_v7  ;;  %v839_v16 = vadd.f32 %v1848_v5, %v1816_v25 }
 0x150   : > { %v1853_v38 = vpop.eup %1284  ;;  %v849_v50 = vadd.f32 %v1851_v61, %v841_v60  ;;  %1310 = vpow2.f32 %v787_v33 }
 0x151   : > { %v1858_v36 = vpop.eup %1286  ;;  %v851_v17 = vadd.f32 %v1853_v38, %v843_v30  ;;  %1312 = vpow2.f32 %v799_v34  ;;  %v339_v34 = vpop.permute.xlu1 %338 }
 0x152   : > { %v1865_v56 = vpop.eup %1288  ;;  %v853_v47 = vadd.f32 %v1858_v36, %v845_v49  ;;  %1314 = vpow2.f32 %v803_v14  ;;  %v479_v9 = vadd.f32 %v478_v42, %v339_v34 }
 0x153   : > { %v1870_v37 = vpop.eup %1290  ;;  %1316 = vpow2.f32 %v807_v15  ;;  %v847_v20 = vadd.f32 %v1865_v56, %v839_v16 }
 0x154   : > { %v1874_v11 = vpop.eup %1292  ;;  %v857_v13 = vadd.f32 %v1870_v37, %v849_v50  ;;  %1318 = vpow2.f32 %v811_v57  ;;  %v334_v57 = vpop.permute.xlu0 %333 }
 0x155   : > { %v1877_v52 = vpop.eup %1294  ;;  %v859_v23 = vadd.f32 %v1874_v11, %v851_v17  ;;  %1320 = vrcp.f32 %v853_v47  ;;  %v475_v10 = vadd.f32 %v474_v12, %v334_v57 }
 0x156   : > { %v1881_v55 = vpop.eup %1296  ;;  %1322 = vrcp.f32 %v857_v13  ;;  %v855_v51 = vadd.f32 %v1877_v52, %v847_v20 }
 0x157   : > { %v1883_v32 = vpop.eup %1298  ;;  %1324 = vrcp.f32 %v859_v23 }
 0x158   : > { %v1885_v54 = vpop.eup %1300  ;;  %1326 = vpow2.f32 %v823_v44  ;;  %v344_v42 = vpop.permute.xlu0 %343 }
 0x159   : > { %v1887_v6 = vpop.eup %1302  ;;  %1328 = vpow2.f32 %v827_v22  ;;  %v486_v22 = vpop.f32.mrf.mxu1 }
 0x15a   : > { %v1890_v62 = vpop.eup %1304  ;;  %1330 = vpow2.f32 %v831_v59 }
 0x15b   : > { %v1894_v58 = vpop.eup %1306  ;;  %1332 = vpow2.f32 %v835_v53  ;;  %v838_v45 = vadd.f32 %v1890_v62, %v1881_v55 }
 0x15c   : > { %v1896_v43 = vpop.eup %1308  ;;  %1334 = vrcp.f32 %v855_v51  ;;  %v840_v2 = vadd.f32 %v1894_v58, %v1883_v32 }
 0x15d   : > { %v1898_v41 = vpop.eup %1310  ;;  %v842_v18 = vadd.f32 %v1896_v43, %v1885_v54 }
 0x15e   : > { %v1900_v24 = vpop.eup %1312  ;;  %v844_v39 = vadd.f32 %v1898_v41, %v1887_v6 }
 0x15f   : > { %v1904_v63 = vpop.eup %1314  ;;  %v846_v7 = vadd.f32 %v1900_v24, %v838_v45 }
 0x160   : > { %v1908_v3 = vpop.eup %1316  ;;  %v848_v60 = vadd.f32 %v1904_v63, %v840_v2 }
 0x161   : > { %v1912_v4 = vpop.eup %1318  ;;  %v850_v29 = vadd.f32 %v1908_v3, %v842_v18 }
 0x162   : > { %v1916_v19 = vpop.eup %1320  ;;  %v852_v49 = vadd.f32 %v1912_v4, %v844_v39  ;;  %v488_v39 = vpop.f32.mrf.mxu1 }
 0x163   : > { %v1323_v27 = vpop.eup %1322  ;;  %v885_v53 = vmul.f32 %v1916_v19, %v1824_v1  ;;  %v349_v1 = vpop.permute.xlu1 %348 }
 0x164   : > { %v1325_v33 = vpop.eup %1324  ;;  %v873_v14 = vmul.f32 %v1323_v27, %v1820_v46  ;;  %v889_v15 = vmul.f32 %v1323_v27, %v1834_v26  ;;  %v869_v26 = vmul.f32 %v1916_v19, %v1812_v48  ;;  %v913_v51 = vmul.f32 %v1323_v27, %v1851_v61 }
 0x165   : > { %v1923_v30 = vpop.eup %1326  ;;  %v875_v17 = vmul.f32 %v1325_v33, %v1828_v21  ;;  %v891_v40 = vmul.f32 %v1325_v33, %v1838_v28  ;;  %v915_v45 = vmul.f32 %v1325_v33, %v1853_v38  ;;  %v485_v48 = vadd.f32 %v484_v8, %v344_v42 }
 0x166   : > { %v1928_v50 = vpop.eup %1328  ;;  %v854_v16 = vadd.f32 %v1923_v30, %v846_v7  ;;  %v881_v21 = vmul.f32 %v873_v14, %v475_v10  ;;  %v897_v23 = vmul.f32 %v889_v15, %v479_v9  ;;  %v937_v15 = vmul.f32 %v1323_v27, %v1870_v37 }
 0x167   : > { %v1933_v47 = vpop.eup %1330  ;;  %v856_v13 = vadd.f32 %v1928_v50, %v848_v60  ;;  %v883_v12 = vmul.f32 %v875_v17, %v475_v10  ;;  %v899_v59 = vmul.f32 %v891_v40, %v479_v9  ;;  %v877_v60 = vmul.f32 %v869_v26, %v475_v10  ;;  %v490_v40 = vpop.f32.mrf.mxu1 }
 0x168   : > { %v1936_v44 = vpop.eup %1332  ;;  %v858_v46 = vadd.f32 %v1933_v47, %v850_v29  ;;  %1336 = vrcp.f32 %v854_v16  ;;  %v905_v2 = vadd.f32 %v897_v23, %v881_v21  ;;  %v921_v14 = vmul.f32 %v913_v51, %v485_v48 }
 0x169   : > { %v860_v20 = vadd.f32 %v1936_v44, %v852_v49  ;;  %1338 = vrcp.f32 %v856_v13  ;;  %v1335_v28 = vpop.eup %1334  ;;  %v907_v7 = vadd.f32 %v899_v59, %v883_v12  ;;  %v893_v49 = vmul.f32 %v885_v53, %v479_v9 }
 0x16a   : > { %1340 = vrcp.f32 %v858_v46  ;;  %v871_v18 = vmul.f32 %v1335_v28, %v1816_v25  ;;  %v887_v29 = vmul.f32 %v1335_v28, %v1848_v5  ;;  %v923_v16 = vmul.f32 %v915_v45, %v485_v48 }
 0x16b   : > { %1342 = vrcp.f32 %v860_v20  ;;  %v939_v61 = vmul.f32 %v1325_v33, %v1874_v11  ;;  %v909_v38 = vmul.f32 %v1916_v19, %v1844_v31  ;;  %v1952_v8 = vadd.f32 %v488_v39, %v349_v1 }
 0x16c   : > { %v929_v17 = vadd.f32 %v921_v14, %v905_v2  ;;  %v911_v25 = vmul.f32 %v1335_v28, %v1865_v56  ;;  %v931_v13 = vadd.f32 %v923_v16, %v907_v7  ;;  %v879_v46 = vmul.f32 %v871_v18, %v475_v10 }
 0x16d   : > { %v895_v5 = vmul.f32 %v887_v29, %v479_v9  ;;  %v901_v26 = vadd.f32 %v893_v49, %v877_v60  ;;  %v477_v20 = vadd.f32 %v1892_v0, %v334_v57  ;;  %v945_v37 = vmul.f32 %v937_v15, %v1952_v8 }
 0x16e   : > { %v481_v27 = vadd.f32 %v1918_v35, %v339_v34  ;;  %v487_v11 = vadd.f32 %v486_v22, %v344_v42  ;;  %v947_v33 = vmul.f32 %v939_v61, %v1952_v8  ;;  %v917_v31 = vmul.f32 %v909_v38, %v485_v48 }
 0x16f   : > { %v491_v23 = vadd.f32 %v490_v40, %v349_v1  ;;  %v1959_v12 = vadd.f32 %v945_v37, %v929_v17  ;;  %v933_v56 = vmul.f32 %v1916_v19, %v1858_v36  ;;  %v935_v10 = vmul.f32 %v1335_v28, %v1877_v52 }
 0x170   : > { %v955_v59 = vadd.f32 %v947_v33, %v931_v13  ;;  %v903_v0 = vadd.f32 %v895_v5, %v879_v46  ;;  %v919_v57 = vmul.f32 %v911_v25, %v485_v48  ;;  %v925_v53 = vadd.f32 %v917_v31, %v901_v26 }
 0x172   : > { %v927_v40 = vadd.f32 %v919_v57, %v903_v0  ;;  %v963_v33 = vpack.c.bf16 %v955_v59, %v1959_v12  ;;  %v1263_v12 = vld [vmem:[%s2053_s3 + $0x8] sm:$0xff]  }
 0x175   : > { %v1337_v21 = vpop.eup %1336 }
 0x176   : > { %v1339_v9 = vpop.eup %1338  ;;  %v870_v35 = vmul.f32 %v1337_v21, %v1881_v55  ;;  %v886_v34 = vmul.f32 %v1337_v21, %v1890_v62  ;;  %v910_v22 = vmul.f32 %v1337_v21, %v1900_v24  ;;  %v934_v42 = vmul.f32 %v1337_v21, %v1923_v30 }
 0x177   : > { %v1341_v51 = vpop.eup %1340  ;;  %v872_v19 = vmul.f32 %v1339_v9, %v1883_v32  ;;  %v888_v62 = vmul.f32 %v1339_v9, %v1894_v58  ;;  %v936_v58 = vmul.f32 %v1339_v9, %v1928_v50  ;;  %v943_v50 = vmul.f32 %v935_v10, %v1952_v8 }
 0x178   : > { %v1343_v45 = vpop.eup %1342  ;;  %v874_v2 = vmul.f32 %v1341_v51, %v1885_v54  ;;  %v890_v36 = vmul.f32 %v1341_v51, %v1896_v43  ;;  %v914_v52 = vmul.f32 %v1341_v51, %v1908_v3  ;;  %v938_v30 = vmul.f32 %v1341_v51, %v1933_v47 }
 0x179   : > { %v876_v28 = vmul.f32 %v1343_v45, %v1887_v6  ;;  %v892_v48 = vmul.f32 %v1343_v45, %v1898_v41  ;;  %v916_v55 = vmul.f32 %v1343_v45, %v1912_v4  ;;  %v912_v54 = vmul.f32 %v1339_v9, %v1904_v63 }
 0x17a   : > { %v882_v24 = vmul.f32 %v874_v2, %v477_v20  ;;  %v898_v18 = vmul.f32 %v890_v36, %v481_v27  ;;  %v922_v7 = vmul.f32 %v914_v52, %v487_v11  ;;  %v940_v3 = vmul.f32 %v1343_v45, %v1936_v44 }
 0x17b   : > { %v884_v39 = vmul.f32 %v876_v28, %v477_v20  ;;  %v900_v43 = vmul.f32 %v892_v48, %v481_v27  ;;  %v878_v60 = vmul.f32 %v870_v35, %v477_v20  ;;  %v880_v6 = vmul.f32 %v872_v19, %v477_v20 }
 0x17c   : > { %v906_v32 = vadd.f32 %v898_v18, %v882_v24  ;;  %v894_v29 = vmul.f32 %v886_v34, %v481_v27  ;;  %v924_v49 = vmul.f32 %v916_v55, %v487_v11  ;;  %v896_v4 = vmul.f32 %v888_v62, %v481_v27 }
 0x17d   : > { %v908_v41 = vadd.f32 %v900_v43, %v884_v39  ;;  %v946_v15 = vmul.f32 %v938_v30, %v491_v23  ;;  %v918_v47 = vmul.f32 %v910_v22, %v487_v11  ;;  %v948_v63 = vmul.f32 %v940_v3, %v491_v23 }
 0x17e   : > { %v930_v14 = vadd.f32 %v922_v7, %v906_v32  ;;  %v902_v1 = vadd.f32 %v894_v29, %v878_v60  ;;  %v904_v61 = vadd.f32 %v896_v4, %v880_v6  ;;  %v920_v38 = vmul.f32 %v912_v54, %v487_v11 }
 0x17f   : > { %v932_v16 = vadd.f32 %v924_v49, %v908_v41  ;;  %v942_v44 = vmul.f32 %v934_v42, %v491_v23  ;;  %v944_v5 = vmul.f32 %v936_v58, %v491_v23  ;;  %v941_v20 = vmul.f32 %v933_v56, %v1952_v8  ;;  %v1262_v23 = vld [vmem:[%s2053_s3] sm:$0xff]   ;;  %v972_v56 = vpop.permute.xlu0 %971 }
 0x180   : > { %v954_v17 = vadd.f32 %v946_v15, %v930_v14  ;;  %v926_v25 = vadd.f32 %v918_v47, %v902_v1  ;;  %v928_v46 = vadd.f32 %v920_v38, %v904_v61  ;;  %v951_v11 = vadd.f32 %v943_v50, %v927_v40 }
 0x181   : > { %v956_v13 = vadd.f32 %v948_v63, %v932_v16  ;;  %v949_v31 = vadd.f32 %v941_v20, %v925_v53  ;;  %v2072_v8 = vmov 0   ;;  %v977_v53 = vpop.permute.xlu1 %976 }
 0x182   : > { %v950_v26 = vadd.f32 %v942_v44, %v926_v25  ;;  %v952_v27 = vadd.f32 %v944_v5, %v928_v46 }
 0x183   : > { %v964_v37 = vpack.c.bf16 %v956_v13, %v954_v17  ;;  %v961_v9 = vpack.c.bf16 %v951_v11, %v949_v31  ;;  %v982_v42 = vpop.permute.xlu0 %981 }
 0x184   : > { %v962_v21 = vpack.c.bf16 %v952_v27, %v950_v26 }
 0x185   : > { %1017 = vmatprep.subr.bf16.mxu1 %v964_v37  ;;  %v987_v19 = vpop.permute.xlu1 %986 }
 0x186   : > { %1018 = vmatpush1.bf16.msra.mxu1 %v963_v33 }
 0x187   : > { %1019 = vmatprep.subr.bf16.mxu1 %v962_v21 }
 0x18a   : > { %1020 = vmatpush1.bf16.msra.mxu1 %v961_v9 }
 0x18d   : > { %1183 = vmatmul.mubr.msk.bf16.vlgmr.msra.gmra.mxu1 %vm381_vm0, %v1262_v23 }
 0x18e   : > { %1047 = vmatprep.mubr.bf16.mxu1 %v2072_v8 }
 0x195   : > { %1184 = vmatmul.mubr.msk.bf16.gmra.mxu1 %vm381_vm0, %v1263_v12 }
 0x24d   : > { %v1039_v10 = vpop.f32.mrf.mxu1 }
 0x24e   : > { %v1040_v59 = vadd.f32 %v1039_v10, %v972_v56 }
 0x24f   : > { %v1041_v0 = vpop.f32.mrf.mxu1 }
 0x250   : > { %1058 = vst [vmem:[%s242_s17] sm:$0xff] %v1040_v59  ;;  %v1042_v57 = vadd.f32 %v1041_v0, %v972_v56 }
 0x251   : > { %v1043_v51 = vpop.f32.mrf.mxu1 }
 0x252   : > { %1059 = vst [vmem:[%s242_s17 + $0x8] sm:$0xff] %v1042_v57  ;;  %v1044_v35 = vadd.f32 %v1043_v51, %v977_v53 }
 0x253   : > { %v1045_v34 = vpop.f32.mrf.mxu1 }
 0x254   : > { %1060 = vst [vmem:[%s242_s17 + $0x10] sm:$0xff] %v1044_v35  ;;  %v1046_v22 = vadd.f32 %v1045_v34, %v977_v53 }
 0x255   : > { %v1049_v45 = vpop.f32.mrf.mxu1 }
 0x256   : > { %1061 = vst [vmem:[%s242_s17 + $0x18] sm:$0xff] %v1046_v22  ;;  %v1050_v2 = vadd.f32 %v1049_v45, %v982_v42 }
 0x257   : > { %v1051_v36 = vpop.f32.mrf.mxu1 }
 0x258   : > { %1062 = vst [vmem:[%s242_s17 + $0x20] sm:$0xff] %v1050_v2  ;;  %v1052_v52 = vadd.f32 %v1051_v36, %v982_v42 }
 0x259   : > { %v1053_v28 = vpop.f32.mrf.mxu1 }
 0x25a   : > { %1063 = vst [vmem:[%s242_s17 + $0x28] sm:$0xff] %v1052_v52  ;;  %v1054_v48 = vadd.f32 %v1053_v28, %v987_v19 }
 0x25b   : > { %v1055_v55 = vpop.f32.mrf.mxu1 }
 0x25c   : > { %1064 = vst [vmem:[%s242_s17 + $0x30] sm:$0xff] %v1054_v48  ;;  %v1056_v62 = vadd.f32 %v1055_v55, %v987_v19 }
 0x25e   : > { %1065 = vst [vmem:[%s242_s17 + $0x38] sm:$0xff] %v1056_v62 }
 0x25f   : > { %1357 = shalt.err (!%p1354_p5)
}
 0x260   : > { %s1358_s12 = scalar_lea.hbm %s1999_s7, 1024  ;;  %s1362_s15 = scalar_lea.hbm %s2055_s5, 2048 }
 0x261   : > { %p1359_p6 = scmp.ne.s32.totalorder %s1999_s7, %s1358_s12  ;;  %p1363_p10 = scmp.lt.s32.totalorder %s1999_s7, %s2055_s5 }
 0x262   : > { %p1364_p11 = scmp.lt.s32.totalorder %s1362_s15, %s1358_s12 }
 0x263   : > { %p1360_p7 = pnand %p1359_p6, %p1496_p4 }
 0x264   : > { %p1365_p12 = por %p1364_p11, %p1363_p10 }
 0x265   : > { %p1361_p9 = pneg %p1360_p7 }
 0x267   : > { %p1366_p13 = pnand %p1365_p12, %p1361_p9 }
 0x269   : > { %1369 = shalt.err (!%p1366_p13)
}
 0x26a   : > { %s1424_s24 = smov 256   ;;  %s1425_s27 = smov 16  }
 0x26b   : > { %1196 = dma.vmem_to_hbm [thread:$0]  (%p1496_p4), %s2001_s25, 1024, %s1999_s7, %s2005_s21, %s1424_s24, %s1424_s24, %s1425_s27  }
 0x26c PF: > { %p1202_p0 = scmp.ge.s32.totalorder %s1420_s23, 2  ;;  %s1097_s29 = sand.u32 1, %s1400_s18  }
 0x26d   : > { %s1098_s8 = scalar_lea.sflag [#allocation3], %s1097_s29 }
 0x26e   : > { %p1199_p1 = pnand %p1202_p0, %p1503_p8 }
 0x270   : > { %p1200_p2 = pneg %p1199_p1 }
 0x272   : > { %1395 = dma.done.wait (%p1200_p2), %s1098_s8, 1024  }
 0x273   : > { %1397 = vsyncadd (%p1200_p2), %s1098_s8, 4294966272  ;;  %s18_s23 = sadd.s32 1, %s1420_s23   ;;  %s2073_s18 = smov %s1404_s19 }
 0x274   : > { %p15_p3 = scmp.ge.s32.totalorder %s18_s23, 4   ;;  %s2074_s19 = smov %s1408_s20 }
 0x275   : > { %s2075_s20 = smov %s1509_s6  ;;  %s2076_s21 = smov %s1416_s22 }
 0x276   : > { %s2077_s22 = smov %s2079_s26  ;;  %17 = sbr.rel (!%p15_p3) target bundleno = 4 (0x4), region = 75 }
 0x27b   :  { %1103 = vsyncpa [#allocation3], 1 }
 0x27c   :  { %1105 = vsyncpa [#allocation3 + $0x1], 1 }

// kernel: tpu_custom_call.1
= control target key start
LH: loop header
LB: loop body
LE: loop exit
PB: predicated region body
PF: predicated region fallthrough
CT: control target
= control target key end

     0   :  { %10 = vsyncpa [#allocation3], 0  ;;  %s2050_s0 = inlined_call_operand.vmem [shape: f32[2,32,256], index: 0, kind: input, shape index: {}]   ;;  %s2051_s1 = inlined_call_operand.vmem [shape: bf16[96,32], index: 1, kind: input, shape index: {}]   ;;  %s2052_s2 = inlined_call_operand.vmem [shape: f32[96,1], index: 2, kind: input, shape index: {}]   ;;  %s2053_s3 = inlined_call_operand.vmem [shape: bf16[32,32], index: 3, kind: input, shape index: {}]   ;;  %s2054_s4 = inlined_call_operand.vmem [shape: f32[32,1], index: 4, kind: input, shape index: {}]   ;;  %s2055_s5 = inlined_call_operand.hbm [shape: f32[2,32,256], index: 5, kind: output, shape index: {}]  }
   0x1   :  { %12 = vsyncpa [#allocation3 + $0x1], 0  ;;  %s1456_s18 = smov 0   ;;  %s1458_s19 = smov 0  }
   0x2   :  { %s1460_s20 = smov 0   ;;  %s1462_s21 = smov 0  }
   0x3   :  { %s1464_s22 = smov 0   ;;  %s1466_s23 = smov 0  }
   0x4 LB: > { %s1161_s24 = sadd.s32 4294967295, %s1420_s23   ;;  %s1162_s25 = sadd.s32 4294967294, %s1420_s23   ;;  %s1420_s23 = sphi %s1466_s23, %s18_s23   ;;  %s1416_s22 = sphi %s1464_s22, %s2077_s22   ;;  %s1412_s21 = sphi %s1462_s21, %s2076_s21   ;;  %s1408_s20 = sphi %s1460_s20, %s2075_s20   ;;  %s1404_s19 = sphi %s1458_s19, %s2074_s19   ;;  %s1400_s18 = sphi %s1456_s18, %s2073_s18  }
   0x5   : > { %s30_s26 = sadd.s32 1, %s1416_s22  ;;  %s151_s27 = sadd.s32 1, %s1408_s20 }
   0x6   : > { %p32_p0 = scmp.ge.s32.totalorder %s30_s26, 2  ;;  %p161_p1 = scmp.ne.s32.totalorder %s1408_s20, %s1404_s19 }
   0x7   : > { %p162_p2 = scmp.eq.s32.totalorder %s1161_s24, 1  ;;  %p167_p3 = scmp.ne.s32.totalorder %s1404_s19, %s1400_s18 }
   0x8   : > { %s2079_s26 = smov (%p32_p0, %s30_s26), 0  ;;  %p168_p5 = scmp.eq.s32.totalorder %s1162_s25, 1 }
   0x9   : > { %p1496_p4 = por %p162_p2, %p161_p1  ;;  %s146_s29 = ssub.s32 %s1416_s22, %s2079_s26 }
   0xa   : > { %p1165_p6 = scmp.ge.s32.totalorder %s1420_s23, 1  ;;  %p149_p7 = scmp.eq.s32.totalorder %s146_s29, 0 }
   0xb   : > { %p1503_p8 = por %p168_p5, %p167_p3  ;;  %p211_p9 = scmp.lt.s32.totalorder %s1420_s23, 3 }
   0xc   : > { %s1509_s6 = scalar_select %p149_p7, %s1408_s20, %s151_s27  }
   0xd   : > { %p212_p10 = pnand %p1165_p6, %p211_p9 }
   0xf   : > { %215 = sbr.rel (%p212_p10) target bundleno = 620 (0x26c), region = 40 }
  0x14   : > { %p244_p11 = scmp.lt.s32.totalorder %s1412_s21, 1  ;;  %v2056_v0 = vmov 0   ;;  %v283_v12 = vld [vmem:[%s2052_s2 + $0x20] sm:$0xff]  ;;  %v281_v13 = vld [vmem:[%s2052_s2 + $0x10] sm:$0xff]  ;;  %v284_v17 = vld [vmem:[%s2052_s2 + $0x28] sm:$0xff]  ;;  %vm381_vm0 = vcmask 261120  }
  0x15   : > { %432 = vmatprep.mubr.bf16.mxu0 %v2056_v0  ;;  %472 = vmatprep.mubr.bf16.mxu1 %v2056_v0  ;;  %v1256_v15 = vld [vmem:[%s2051_s1] sm:$0xff]   ;;  %v282_v18 = vld [vmem:[%s2052_s2 + $0x18] sm:$0xff]  ;;  %v285_v20 = vld [vmem:[%s2052_s2 + $0x30] sm:$0xff]  ;;  %s240_s15 = sand.u32 1, %s1404_s19   ;;  %s1191_s24 = sshll.u32 %s1412_s21, 10 }
  0x16   : > { %s245_s7 = scalar_select %p244_p11, %s1412_s21, 1  ;;  %1255 = vset.pattern.permute.xlu1 %v2056_v0  ;;  %1254 = vset.pattern.permute.xlu0 %v2056_v0  ;;  %v1257_v16 = vld [vmem:[%s2051_s1 + $0x20] sm:$0xff]   ;;  %v1258_v21 = vld [vmem:[%s2051_s1 + $0x8] sm:$0xff]   ;;  %v286_v23 = vld [vmem:[%s2052_s2 + $0x38] sm:$0xff] }
  0x17   : > { %313 = vperm.xlu1 %1255, %v283_v12   ;;  %303 = vperm.xlu0 %1254, %v281_v13   ;;  %v279_v19 = vld [vmem:[%s2052_s2] sm:$0xff]  ;;  %v1259_v22 = vld [vmem:[%s2051_s1 + $0x28] sm:$0xff]   ;;  %v1260_v27 = vld [vmem:[%s2051_s1 + $0x10] sm:$0xff]   ;;  %s1166_s16 = sshll.u32 %s240_s15, 6  ;;  %s2005_s21 = scalar_lea.sflag [#allocation3], %s240_s15 }
  0x18   : > { %s1190_s8 = sshll.u32 %s245_s7, 6  ;;  %v280_v24 = vld [vmem:[%s2052_s2 + $0x8] sm:$0xff]  ;;  %v287_v26 = vld [vmem:[%s2052_s2 + $0x40] sm:$0xff]  ;;  %v290_v28 = vld [vmem:[%s2052_s2 + $0x58] sm:$0xff]  ;;  %s242_s17 = scalar_lea.vmem [#allocation2], %s1166_s16 }
  0x19   : > { %s251_s11 = scalar_lea.vmem %s2050_s0, %s1190_s8  ;;  %v288_v25 = vld [vmem:[%s2052_s2 + $0x48] sm:$0xff]  ;;  %v289_v29 = vld [vmem:[%s2052_s2 + $0x50] sm:$0xff]  ;;  %v965_v31 = vld [vmem:[%s2054_s4] sm:$0xff]  ;;  %s1082_s25 = sshll.u32 %s242_s17, 4  ;;  %s2001_s25 = int_to_ptr.vmem [resolvable:$true] %s1082_s25 }
  0x1a   : > { %v260_v1 = vld [vmem:[%s251_s11 + $0x28] sm:$0xff]  ;;  %v262_v2 = vld [vmem:[%s251_s11 + $0x38] sm:$0xff]  ;;  %v259_v3 = vld [vmem:[%s251_s11 + $0x20] sm:$0xff]  ;;  %s1999_s7 = scalar_lea.hbm %s2055_s5, %s1191_s24  ;;  %s1344_s8 = scalar_lea.vmem %s2001_s25, 1024 }
  0x1b   : > { %v278_v4 = vpack.c.bf16 %v262_v2, %v260_v1  ;;  %v261_v5 = vld [vmem:[%s251_s11 + $0x30] sm:$0xff]  ;;  %v256_v6 = vld [vmem:[%s251_s11 + $0x8] sm:$0xff]  ;;  %v258_v7 = vld [vmem:[%s251_s11 + $0x18] sm:$0xff]  ;;  %318 = vperm.xlu1 %1255, %v284_v17   ;;  %308 = vperm.xlu0 %1254, %v282_v18   ;;  %p1345_p12 = scmp.ne.s32.totalorder %s2001_s25, %s1344_s8  ;;  %s1423_s9 = smov [#allocation2]  }
  0x1c   : > { %v277_v8 = vpack.c.bf16 %v261_v5, %v259_v3  ;;  %v276_v9 = vpack.c.bf16 %v258_v7, %v256_v6  ;;  %v255_v10 = vld [vmem:[%s251_s11] sm:$0xff]  ;;  %v257_v11 = vld [vmem:[%s251_s11 + $0x10] sm:$0xff]  ;;  %v966_v30 = vld [vmem:[%s2054_s4 + $0x8] sm:$0xff]  ;;  %s1348_s10 = sshll.u32 %s1423_s9, 4  ;;  %s1349_s10 = int_to_ptr.vmem [resolvable:$false] %s1348_s10 }
  0x1d   : > { %412 = vmatprep.subr.bf16.mxu0 %v278_v4  ;;  %1192 = vmatprep.subr.bf16.mxu1 %v278_v4  ;;  %v275_v14 = vpack.c.bf16 %v257_v11, %v255_v10  ;;  %v1261_v32 = vld [vmem:[%s2051_s1 + $0x18] sm:$0xff]   ;;  %v967_v34 = vld [vmem:[%s2054_s4 + $0x10] sm:$0xff]  ;;  %p1346_p13 = pnand %p1345_p12, %p1496_p4  ;;  %s1350_s11 = scalar_lea.vmem %s1349_s10, 2048 }
  0x1e   : > { %413 = vmatpush1.bf16.msra.mxu0 %v277_v8  ;;  %1194 = vmatpush1.bf16.msra.mxu1 %v277_v8  ;;  %v968_v33 = vld [vmem:[%s2054_s4 + $0x18] sm:$0xff]  ;;  %p1351_p1 = scmp.lt.s32.totalorder %s2001_s25, %s1349_s10  ;;  %p1352_p2 = scmp.lt.s32.totalorder %s1350_s11, %s1344_s8 }
  0x1f   : > { %414 = vmatprep.subr.bf16.mxu0 %v276_v9  ;;  %1193 = vmatprep.subr.bf16.mxu1 %v276_v9  ;;  %p1347_p0 = pneg %p1346_p13 }
  0x20   : > { %293 = vperm.xlu1 %1255, %v279_v19   ;;  %323 = vperm.xlu0 %1254, %v285_v20   ;;  %p1353_p3 = por %p1352_p2, %p1351_p1 }
  0x22   : > { %415 = vmatpush1.bf16.msra.mxu0 %v275_v14  ;;  %1195 = vmatpush1.bf16.msra.mxu1 %v275_v14  ;;  %p1354_p5 = pnand %p1353_p3, %p1347_p0 }
  0x24   : > { %328 = vperm.xlu1 %1255, %v286_v23   ;;  %298 = vperm.xlu0 %1254, %v280_v24  }
  0x25   : > { %1175 = vmatmul.mubr.msk.bf16.vlgmr.msra.gmra.mxu0 %vm381_vm0, %v1256_v15  ;;  %1179 = vmatmul.mubr.msk.bf16.vlgmr.msra.gmra.mxu1 %vm381_vm0, %v1257_v16 }
  0x26   : > { %442 = vmatprep.mubr.bf16.mxu0 %v2056_v0  ;;  %482 = vmatprep.mubr.bf16.mxu1 %v2056_v0 }
  0x28   : > { %338 = vperm.xlu1 %1255, %v288_v25   ;;  %333 = vperm.xlu0 %1254, %v287_v26  }
  0x2c   : > { %348 = vperm.xlu1 %1255, %v290_v28   ;;  %343 = vperm.xlu0 %1254, %v289_v29  }
  0x2d   : > { %1176 = vmatmul.mubr.msk.bf16.gmra.mxu0 %vm381_vm0, %v1258_v21  ;;  %1180 = vmatmul.mubr.msk.bf16.gmra.mxu1 %vm381_vm0, %v1259_v22 }
  0x2e   : > { %452 = vmatprep.mubr.bf16.mxu0 %v2056_v0  ;;  %1037 = vmatprep.mubr.bf16.mxu1 %v2056_v0 }
  0x30   : > { %976 = vperm.xlu1 %1255, %v966_v30   ;;  %971 = vperm.xlu0 %1254, %v965_v31  }
  0x34   : > { %986 = vperm.xlu1 %1255, %v968_v33   ;;  %981 = vperm.xlu0 %1254, %v967_v34  }
  0x35   : > { %1177 = vmatmul.mubr.msk.bf16.gmra.mxu0 %vm381_vm0, %v1260_v27 }
  0x36   : > { %462 = vmatprep.mubr.bf16.mxu0 %v2056_v0 }
  0x3d   : > { %1178 = vmatmul.mubr.msk.bf16.gmra.mxu0 %vm381_vm0, %v1261_v32 }
  0x92   : > { %v304_v35 = vpop.permute.xlu0 %303  ;;  %v314_v38 = vpop.permute.xlu1 %313 }
  0x96   : > { %v309_v39 = vpop.permute.xlu0 %308  ;;  %v319_v43 = vpop.permute.xlu1 %318 }
  0x9b   : > { %v1597_v44 = vpop.permute.xlu0 %323  ;;  %v294_v48 = vpop.permute.xlu1 %293 }
  0x9f   : > { %v299_v50 = vpop.permute.xlu0 %298 }
  0xe5   : > { %v434_v36 = vpop.f32.mrf.mxu0 }
  0xe6   : > { %v1599_v49 = vadd.f32 %v434_v36, %v294_v48 }
  0xe7   : > { %v436_v37 = vpop.f32.mrf.mxu0 }
  0xe8   : > { %v1607_v56 = vadd.f32 %v436_v37, %v294_v48 }
  0xe9   : > { %v438_v40 = vpop.f32.mrf.mxu0 }
  0xea   : > { %v1601_v52 = vadd.f32 %v438_v40, %v299_v50 }
  0xeb   : > { %v440_v41 = vpop.f32.mrf.mxu0 }
  0xec   : > { %v1613_v62 = vadd.f32 %v440_v41, %v299_v50 }
  0xed   : > { %v444_v42 = vpop.f32.mrf.mxu0 }
  0xee   : > { %v1603_v53 = vadd.f32 %v444_v42, %v304_v35 }
  0xef   : > { %v446_v45 = vpop.f32.mrf.mxu0 }
  0xf0   : > { %v1615_v63 = vadd.f32 %v446_v45, %v304_v35 }
  0xf1   : > { %v448_v46 = vpop.f32.mrf.mxu0 }
  0xf2   : > { %v1605_v54 = vadd.f32 %v448_v46, %v309_v39 }
  0xf3   : > { %v450_v47 = vpop.f32.mrf.mxu0 }
  0xf4   : > { %v1617_v1 = vadd.f32 %v450_v47, %v309_v39 }
  0xf5   : > { %v454_v51 = vpop.f32.mrf.mxu0 }
  0xf6   : > { %v455_v55 = vadd.f32 %v454_v51, %v314_v38 }
  0xf7   : > { %v456_v57 = vpop.f32.mrf.mxu0 }
  0xf8   : > { %v493_v58 = vmul.f32 %v455_v55, %v1599_v49  ;;  %v495_v59 = vmul.f32 %v455_v55, %v1601_v52  ;;  %v497_v60 = vmul.f32 %v455_v55, %v1603_v53  ;;  %v499_v61 = vmul.f32 %v455_v55, %v1605_v54 }
  0xf9   : > { %v457_v2 = vadd.f32 %v456_v57, %v314_v38  ;;  %v458_v19 = vpop.f32.mrf.mxu0 }
  0xfa   : > { %v501_v3 = vrot.slane %v493_v58, 4  ;;  %v513_v4 = vrot.slane %v495_v59, 4  ;;  %v525_v5 = vrot.slane %v497_v60, 4  ;;  %v537_v6 = vrot.slane %v499_v61, 4 }
  0xfb   : > { %v494_v7 = vmul.f32 %v457_v2, %v1607_v56  ;;  %v496_v8 = vmul.f32 %v457_v2, %v1613_v62  ;;  %v498_v9 = vmul.f32 %v457_v2, %v1615_v63  ;;  %v500_v10 = vmul.f32 %v457_v2, %v1617_v1  ;;  %v460_v28 = vpop.f32.mrf.mxu0 }
  0xfc   : > { %v502_v11 = vadd.f32 %v501_v3, %v493_v58  ;;  %v514_v12 = vadd.f32 %v513_v4, %v495_v59  ;;  %v526_v13 = vadd.f32 %v525_v5, %v497_v60  ;;  %v538_v14 = vadd.f32 %v537_v6, %v499_v61 }
  0xfd   : > { %v507_v15 = vrot.slane %v494_v7, 4  ;;  %v519_v16 = vrot.slane %v496_v8, 4  ;;  %v531_v17 = vrot.slane %v498_v9, 4  ;;  %v543_v18 = vrot.slane %v500_v10, 4 }
  0xfe   : > { %v503_v20 = vrot.slane %v502_v11, 2  ;;  %v515_v21 = vrot.slane %v514_v12, 2  ;;  %v527_v22 = vrot.slane %v526_v13, 2  ;;  %v539_v23 = vrot.slane %v538_v14, 2 }
  0xff   : > { %v508_v24 = vadd.f32 %v507_v15, %v494_v7  ;;  %v520_v25 = vadd.f32 %v519_v16, %v496_v8  ;;  %v532_v26 = vadd.f32 %v531_v17, %v498_v9  ;;  %v544_v27 = vadd.f32 %v543_v18, %v500_v10  ;;  %v464_v9 = vpop.f32.mrf.mxu0 }
 0x100   : > { %v504_v29 = vadd.f32 %v503_v20, %v502_v11  ;;  %v516_v30 = vadd.f32 %v515_v21, %v514_v12  ;;  %v528_v31 = vadd.f32 %v527_v22, %v526_v13  ;;  %v540_v32 = vadd.f32 %v539_v23, %v538_v14 }
 0x101   : > { %v459_v33 = vadd.f32 %v458_v19, %v319_v43  ;;  %v461_v34 = vadd.f32 %v460_v28, %v319_v43  ;;  %v509_v35 = vrot.slane %v508_v24, 2  ;;  %v521_v36 = vrot.slane %v520_v25, 2 }
 0x102   : > { %v533_v37 = vrot.slane %v532_v26, 2  ;;  %v545_v38 = vrot.slane %v544_v27, 2  ;;  %v505_v61 = vrot.slane %v504_v29, 1  ;;  %v517_v2 = vrot.slane %v516_v30, 1 }
 0x103   : > { %v549_v39 = vmul.f32 %v459_v33, %v1599_v49  ;;  %v551_v40 = vmul.f32 %v459_v33, %v1601_v52  ;;  %v553_v41 = vmul.f32 %v459_v33, %v1603_v53  ;;  %v555_v42 = vmul.f32 %v459_v33, %v1605_v54 }
 0x104   : > { %v550_v45 = vmul.f32 %v461_v34, %v1607_v56  ;;  %v552_v46 = vmul.f32 %v461_v34, %v1613_v62  ;;  %v554_v47 = vmul.f32 %v461_v34, %v1615_v63  ;;  %v556_v43 = vmul.f32 %v461_v34, %v1617_v1 }
 0x105   : > { %v557_v48 = vrot.slane %v549_v39, 4  ;;  %v569_v50 = vrot.slane %v551_v40, 4  ;;  %v581_v51 = vrot.slane %v553_v41, 4  ;;  %v593_v55 = vrot.slane %v555_v42, 4 }
 0x106   : > { %v563_v57 = vrot.slane %v550_v45, 4  ;;  %v575_v58 = vrot.slane %v552_v46, 4  ;;  %v587_v59 = vrot.slane %v554_v47, 4  ;;  %v599_v60 = vrot.slane %v556_v43, 4 }
 0x107   : > { %v558_v3 = vadd.f32 %v557_v48, %v549_v39  ;;  %v570_v4 = vadd.f32 %v569_v50, %v551_v40  ;;  %v510_v5 = vadd.f32 %v509_v35, %v508_v24  ;;  %v522_v6 = vadd.f32 %v521_v36, %v520_v25 }
 0x108   : > { %v534_v7 = vadd.f32 %v533_v37, %v532_v26  ;;  %v546_v8 = vadd.f32 %v545_v38, %v544_v27  ;;  %v582_v10 = vadd.f32 %v581_v51, %v553_v41  ;;  %v594_v11 = vadd.f32 %v593_v55, %v555_v42  ;;  %v466_v26 = vpop.f32.mrf.mxu0 }
 0x109   : > { %v564_v12 = vadd.f32 %v563_v57, %v550_v45  ;;  %v576_v13 = vadd.f32 %v575_v58, %v552_v46  ;;  %v559_v14 = vrot.slane %v558_v3, 2  ;;  %v571_v15 = vrot.slane %v570_v4, 2 }
 0x10a   : > { %v588_v16 = vadd.f32 %v587_v59, %v554_v47  ;;  %v600_v17 = vadd.f32 %v599_v60, %v556_v43  ;;  %v1631_v18 = vadd.f32 %v505_v61, %v504_v29  ;;  %v1633_v19 = vadd.f32 %v517_v2, %v516_v30 }
 0x10b   : > { %v529_v20 = vrot.slane %v528_v31, 1  ;;  %v541_v21 = vrot.slane %v540_v32, 1  ;;  %v511_v22 = vrot.slane %v510_v5, 1  ;;  %v523_v23 = vrot.slane %v522_v6, 1 }
 0x10c   : > { %v535_v24 = vrot.slane %v534_v7, 1  ;;  %v547_v25 = vrot.slane %v546_v8, 1  ;;  %v583_v27 = vrot.slane %v582_v10, 2  ;;  %v595_v28 = vrot.slane %v594_v11, 2 }
 0x10d   : > { %v565_v33 = vrot.slane %v564_v12, 2  ;;  %v577_v34 = vrot.slane %v576_v13, 2  ;;  %v560_v35 = vadd.f32 %v559_v14, %v558_v3  ;;  %v572_v36 = vadd.f32 %v571_v15, %v570_v4 }
 0x10e   : > { %v589_v37 = vrot.slane %v588_v16, 2  ;;  %v601_v38 = vrot.slane %v600_v17, 2  ;;  %v1635_v39 = vadd.f32 %v529_v20, %v528_v31  ;;  %v1637_v29 = vadd.f32 %v541_v21, %v540_v32 }
 0x10f   : > { %v465_v30 = vadd.f32 %v464_v9, %v1597_v44  ;;  %v467_v40 = vadd.f32 %v466_v26, %v1597_v44  ;;  %v1641_v41 = vadd.f32 %v511_v22, %v510_v5  ;;  %v1643_v42 = vadd.f32 %v523_v23, %v522_v6 }
 0x110   : > { %v1645_v45 = vadd.f32 %v535_v24, %v534_v7  ;;  %v1647_v46 = vadd.f32 %v547_v25, %v546_v8  ;;  %v584_v47 = vadd.f32 %v583_v27, %v582_v10  ;;  %v596_v43 = vadd.f32 %v595_v28, %v594_v11 }
 0x111   : > { %v566_v48 = vadd.f32 %v565_v33, %v564_v12  ;;  %v578_v50 = vadd.f32 %v577_v34, %v576_v13  ;;  %v561_v31 = vrot.slane %v560_v35, 1  ;;  %v573_v51 = vrot.slane %v572_v36, 1 }
 0x112   : > { %v590_v32 = vadd.f32 %v589_v37, %v588_v16  ;;  %v602_v55 = vadd.f32 %v601_v38, %v600_v17  ;;  %v605_v57 = vmul.f32 %v465_v30, %v1599_v49  ;;  %v607_v44 = vmul.f32 %v465_v30, %v1601_v52 }
 0x113   : > { %v609_v58 = vmul.f32 %v465_v30, %v1603_v53  ;;  %v611_v59 = vmul.f32 %v465_v30, %v1605_v54  ;;  %v606_v60 = vmul.f32 %v467_v40, %v1607_v56  ;;  %v608_v61 = vmul.f32 %v467_v40, %v1613_v62 }
 0x114   : > { %v610_v2 = vmul.f32 %v467_v40, %v1615_v63  ;;  %v612_v3 = vmul.f32 %v467_v40, %v1617_v1  ;;  %v613_v4 = vrot.slane %v605_v57, 4  ;;  %v625_v5 = vrot.slane %v607_v44, 4 }
 0x115   : > { %v637_v6 = vrot.slane %v609_v58, 4  ;;  %v649_v7 = vrot.slane %v611_v59, 4  ;;  %v619_v8 = vrot.slane %v606_v60, 4  ;;  %v631_v9 = vrot.slane %v608_v61, 4 }
 0x116   : > { %v643_v10 = vrot.slane %v610_v2, 4  ;;  %v655_v11 = vrot.slane %v612_v3, 4  ;;  %v614_v12 = vadd.f32 %v613_v4, %v605_v57  ;;  %v626_v13 = vadd.f32 %v625_v5, %v607_v44 }
 0x117   : > { %v638_v14 = vadd.f32 %v637_v6, %v609_v58  ;;  %v650_v15 = vadd.f32 %v649_v7, %v611_v59  ;;  %v620_v16 = vadd.f32 %v619_v8, %v606_v60  ;;  %v632_v17 = vadd.f32 %v631_v9, %v608_v61  ;;  %v468_v59 = vpop.f32.mrf.mxu0 }
 0x118   : > { %v644_v20 = vadd.f32 %v643_v10, %v610_v2  ;;  %v656_v21 = vadd.f32 %v655_v11, %v612_v3  ;;  %v585_v22 = vrot.slane %v584_v47, 1  ;;  %v597_v23 = vrot.slane %v596_v43, 1  ;;  %v329_v11 = vpop.permute.xlu1 %328 }
 0x119   : > { %v567_v24 = vrot.slane %v566_v48, 1  ;;  %v615_v25 = vrot.slane %v614_v12, 2  ;;  %v579_v26 = vrot.slane %v578_v50, 1  ;;  %v591_v27 = vrot.slane %v590_v32, 1 }
 0x11a   : > { %v627_v28 = vrot.slane %v626_v13, 2  ;;  %v639_v33 = vrot.slane %v638_v14, 2  ;;  %v1657_v34 = vadd.f32 %v561_v31, %v560_v35  ;;  %v603_v37 = vrot.slane %v602_v55, 1 }
 0x11b   : > { %v651_v38 = vrot.slane %v650_v15, 2  ;;  %v621_v30 = vrot.slane %v620_v16, 2  ;;  %v616_v40 = vadd.f32 %v615_v25, %v614_v12  ;;  %v633_v57 = vrot.slane %v632_v17, 2 }
 0x11c   : > { %v645_v44 = vrot.slane %v644_v20, 2  ;;  %v657_v58 = vrot.slane %v656_v21, 2  ;;  %v1659_v60 = vadd.f32 %v573_v51, %v572_v36  ;;  %v1661_v61 = vadd.f32 %v585_v22, %v584_v47 }
 0x11d   : > { %v1663_v2 = vadd.f32 %v597_v23, %v596_v43  ;;  %v1665_v3 = vadd.f32 %v567_v24, %v566_v48  ;;  %v1667_v4 = vadd.f32 %v579_v26, %v578_v50  ;;  %v1669_v35 = vadd.f32 %v591_v27, %v590_v32  ;;  %v470_v50 = vpop.f32.mrf.mxu0 }
 0x11e   : > { %2063 = vst [vmem:[#allocation5_spill] sm:$0xff] %v1659_v60  ;;  %v628_v31 = vadd.f32 %v627_v28, %v626_v13  ;;  %v640_v5 = vadd.f32 %v639_v33, %v638_v14  ;;  %v717_v6 = vmax.f32 %v1631_v18, %v1657_v34  ;;  %v1673_v7 = vadd.f32 %v603_v37, %v602_v55 }
 0x11f   : > { %2064 = vst [vmem:[#allocation6_spill] sm:$0xff] %v1663_v2  ;;  %2065 = vst [vmem:[#allocation7_spill] sm:$0xff] %v1669_v35  ;;  %v652_v8 = vadd.f32 %v651_v38, %v650_v15  ;;  %v622_v36 = vadd.f32 %v621_v30, %v620_v16  ;;  %v617_v51 = vrot.slane %v616_v40, 1  ;;  %v1675_v47 = vadd.f32 %v633_v57, %v632_v17 }
 0x120   : > { %v1677_v43 = vadd.f32 %v645_v44, %v644_v20  ;;  %v1679_v48 = vadd.f32 %v657_v58, %v656_v21  ;;  %v719_v32 = vmax.f32 %v1633_v19, %v1659_v60  ;;  %v721_v9 = vmax.f32 %v1635_v39, %v1661_v61 }
 0x121   : > { %v723_v55 = vmax.f32 %v1637_v29, %v1663_v2  ;;  %v629_v14 = vrot.slane %v628_v31, 1  ;;  %v641_v15 = vrot.slane %v640_v5, 1  ;;  %v653_v16 = vrot.slane %v652_v8, 1 }
 0x122   : > { %v623_v17 = vrot.slane %v622_v36, 1  ;;  %v469_v20 = vadd.f32 %v468_v59, %v329_v11  ;;  %v471_v21 = vadd.f32 %v470_v50, %v329_v11  ;;  %v1693_v22 = vadd.f32 %v617_v51, %v616_v40 }
 0x123   : > { %v635_v23 = vrot.slane %v1675_v47, 1  ;;  %v647_v24 = vrot.slane %v1677_v43, 1  ;;  %v659_v25 = vrot.slane %v1679_v48, 1  ;;  %v1710_v10 = vadd.f32 %v653_v16, %v652_v8 }
 0x124   : > { %v661_v26 = vmul.f32 %v469_v20, %v1599_v49  ;;  %v663_v27 = vmul.f32 %v469_v20, %v1601_v52  ;;  %v665_v28 = vmul.f32 %v469_v20, %v1603_v53  ;;  %v667_v33 = vmul.f32 %v469_v20, %v1605_v54 }
 0x125   : > { %v662_v37 = vmul.f32 %v471_v21, %v1607_v56  ;;  %v664_v38 = vmul.f32 %v471_v21, %v1613_v62  ;;  %v666_v30 = vmul.f32 %v471_v21, %v1615_v63  ;;  %v668_v40 = vmul.f32 %v471_v21, %v1617_v1 }
 0x126   : > { %v669_v57 = vrot.slane %v661_v26, 4  ;;  %v681_v44 = vrot.slane %v663_v27, 4  ;;  %v693_v58 = vrot.slane %v665_v28, 4  ;;  %v705_v59 = vrot.slane %v667_v33, 4 }
 0x127   : > { %v675_v51 = vrot.slane %v662_v37, 4  ;;  %v687_v49 = vrot.slane %v664_v38, 4  ;;  %v699_v50 = vrot.slane %v666_v30, 4  ;;  %v711_v52 = vrot.slane %v668_v40, 4 }
 0x128   : > { %v670_v11 = vadd.f32 %v669_v57, %v661_v26  ;;  %v682_v53 = vadd.f32 %v681_v44, %v663_v27  ;;  %v694_v0 = vadd.f32 %v693_v58, %v665_v28  ;;  %v706_v54 = vadd.f32 %v705_v59, %v667_v33 }
 0x129   : > { %v1706_v20 = vadd.f32 %v629_v14, %v628_v31  ;;  %v1708_v56 = vadd.f32 %v641_v15, %v640_v5  ;;  %v676_v62 = vadd.f32 %v675_v51, %v662_v37  ;;  %v688_v63 = vadd.f32 %v687_v49, %v664_v38 }
 0x12a   : > { %v671_v13 = vrot.slane %v670_v11, 2  ;;  %v683_v1 = vrot.slane %v682_v53, 2  ;;  %v695_v21 = vrot.slane %v694_v0, 2  ;;  %v707_v12 = vrot.slane %v706_v54, 2 }
 0x12b   : > { %v1712_v60 = vadd.f32 %v623_v17, %v622_v36  ;;  %v700_v2 = vadd.f32 %v699_v50, %v666_v30  ;;  %v712_v35 = vadd.f32 %v711_v52, %v668_v40  ;;  %v725_v31 = vmax.f32 %v717_v6, %v1693_v22 }
 0x12c   : > { %v672_v26 = vadd.f32 %v671_v13, %v670_v11  ;;  %v684_v27 = vadd.f32 %v683_v1, %v682_v53  ;;  %v696_v28 = vadd.f32 %v695_v21, %v694_v0  ;;  %v708_v33 = vadd.f32 %v707_v12, %v706_v54 }
 0x12d   : > { %v727_v5 = vmax.f32 %v719_v32, %v1706_v20  ;;  %v677_v14 = vrot.slane %v676_v62, 2  ;;  %v689_v15 = vrot.slane %v688_v63, 2  ;;  %v729_v8 = vmax.f32 %v721_v9, %v1708_v56 }
 0x12e   : > { %v673_v37 = vrot.slane %v672_v26, 1  ;;  %v685_v38 = vrot.slane %v684_v27, 1  ;;  %v697_v57 = vrot.slane %v696_v28, 1  ;;  %v709_v44 = vrot.slane %v708_v33, 1 }
 0x12f   : > { %v731_v36 = vmax.f32 %v723_v55, %v1710_v10  ;;  %v701_v16 = vrot.slane %v700_v2, 2  ;;  %v713_v17 = vrot.slane %v712_v35, 2  ;;  %v724_v32 = vmax.f32 %v1647_v46, %v1673_v7 }
 0x130   : > { %v1718_v13 = vadd.f32 %v673_v37, %v672_v26  ;;  %v1720_v0 = vadd.f32 %v685_v38, %v684_v27  ;;  %v1722_v12 = vadd.f32 %v697_v57, %v696_v28  ;;  %v1724_v6 = vadd.f32 %v709_v44, %v708_v33  ;;  %v2070_v27 = vld [vmem:[#allocation6_spill] sm:$0xff] }
 0x131   : > { %v1729_v30 = vadd.f32 %v635_v23, %v1675_v47  ;;  %v678_v40 = vadd.f32 %v677_v14, %v676_v62  ;;  %v690_v9 = vadd.f32 %v689_v15, %v688_v63  ;;  %v1740_v49 = vadd.f32 %v647_v24, %v1677_v43 }
 0x132   : > { %v733_v55 = vmax.f32 %v725_v31, %v1718_v13  ;;  %v1733_v58 = vmax.f32 %v727_v5, %v1720_v0  ;;  %v737_v59 = vmax.f32 %v729_v8, %v1722_v12  ;;  %v1737_v51 = vmax.f32 %v731_v36, %v1724_v6 }
 0x133   : > { %v1743_v50 = vadd.f32 %v659_v25, %v1679_v48  ;;  %v2066_v47 = vmax.f32 %v1641_v41, %v1665_v3  ;;  %v702_v52 = vadd.f32 %v701_v16, %v700_v2  ;;  %v714_v62 = vadd.f32 %v713_v17, %v712_v35 }
 0x134   : > { %v741_v11 = vsub.f32 %v1631_v18, %v733_v55  ;;  %v743_v53 = vsub.f32 %v1633_v19, %v1733_v58  ;;  %v745_v54 = vsub.f32 %v1635_v39, %v737_v59  ;;  %v2067_v43 = vmax.f32 %v1643_v42, %v1667_v4  ;;  %v2068_v19 = vld [vmem:[#allocation7_spill] sm:$0xff] }
 0x135   : > { %v726_v23 = vmax.f32 %v2066_v47, %v1712_v60  ;;  %v747_v24 = vsub.f32 %v1637_v29, %v1737_v51  ;;  %v765_v25 = vsub.f32 %v1657_v34, %v733_v55  ;;  %v679_v63 = vrot.slane %v678_v40, 1 }
 0x136   : > { %v728_v48 = vmax.f32 %v2067_v43, %v1729_v30  ;;  %v749_v2 = vmul.f32 1.442695, %v741_v11  ;;  %v753_v1 = vmul.f32 1.442695, %v743_v53  ;;  %v769_v18 = vsub.f32 %v1661_v61, %v737_v59  ;;  %v2071_v61 = vld [vmem:[#allocation5_spill] sm:$0xff] }
 0x137   : > { %v691_v21 = vrot.slane %v690_v9, 1  ;;  %v2069_v39 = vmax.f32 %v1645_v45, %v2068_v19  ;;  %v757_v26 = vmul.f32 1.442695, %v745_v54  ;;  %v771_v28 = vsub.f32 %v2070_v27, %v1737_v51 }
 0x138   : > { %v703_v33 = vrot.slane %v702_v52, 1  ;;  %v732_v29 = vmax.f32 %v724_v32, %v1743_v50  ;;  %v773_v31 = vmul.f32 1.442695, %v765_v25  ;;  %v789_v34 = vsub.f32 %v1693_v22, %v733_v55 }
 0x139   : > { %v730_v35 = vmax.f32 %v2069_v39, %v1740_v49  ;;  %v715_v5 = vrot.slane %v714_v62, 1  ;;  %1264 = vpow2.f32 %v749_v2  ;;  %v761_v14 = vmul.f32 1.442695, %v747_v24 }
 0x13a   : > { %v767_v15 = vsub.f32 %v2071_v61, %v1733_v58  ;;  %v1771_v37 = vadd.f32 %v679_v63, %v678_v40  ;;  %1266 = vpow2.f32 %v753_v1  ;;  %v781_v38 = vmul.f32 1.442695, %v769_v18 }
 0x13b   : > { %v793_v57 = vsub.f32 %v1708_v56, %v737_v59  ;;  %v1774_v44 = vadd.f32 %v691_v21, %v690_v9  ;;  %1268 = vpow2.f32 %v757_v26  ;;  %v785_v8 = vmul.f32 1.442695, %v771_v28 }
 0x13c   : > { %v795_v36 = vsub.f32 %v1710_v10, %v1737_v51  ;;  %v1778_v22 = vadd.f32 %v703_v33, %v702_v52  ;;  %1270 = vpow2.f32 %v773_v31  ;;  %v797_v16 = vmul.f32 1.442695, %v789_v34 }
 0x13d   : > { %v813_v17 = vsub.f32 %v1718_v13, %v733_v55  ;;  %v1781_v32 = vadd.f32 %v715_v5, %v714_v62  ;;  %1272 = vpow2.f32 %v761_v14  ;;  %v777_v40 = vmul.f32 1.442695, %v767_v15 }
 0x13e   : > { %v791_v56 = vsub.f32 %v1706_v20, %v1733_v58  ;;  %v1786_v9 = vmax.f32 %v726_v23, %v1771_v37  ;;  %1274 = vpow2.f32 %v781_v38  ;;  %v805_v47 = vmul.f32 1.442695, %v793_v57 }
 0x13f   : > { %v817_v10 = vsub.f32 %v1722_v12, %v737_v59  ;;  %v1790_v52 = vmax.f32 %v728_v48, %v1774_v44  ;;  %1276 = vpow2.f32 %v785_v8  ;;  %v809_v11 = vmul.f32 1.442695, %v795_v36 }
 0x140   : > { %v819_v13 = vsub.f32 %v1724_v6, %v1737_v51  ;;  %v1795_v55 = vmax.f32 %v730_v35, %v1778_v22  ;;  %1278 = vpow2.f32 %v797_v16  ;;  %v815_v20 = vsub.f32 %v1720_v0, %v1733_v58 }
 0x141   : > { %v821_v23 = vmul.f32 1.442695, %v813_v17  ;;  %v1800_v53 = vmax.f32 %v732_v29, %v1781_v32  ;;  %1280 = vpow2.f32 %v777_v40  ;;  %v801_v12 = vmul.f32 1.442695, %v791_v56 }
 0x142   : > { %v742_v59 = vsub.f32 %v1641_v41, %v1786_v9  ;;  %1282 = vpow2.f32 %v805_v47  ;;  %v829_v54 = vmul.f32 1.442695, %v817_v10  ;;  %v744_v6 = vsub.f32 %v1643_v42, %v1790_v52 }
 0x143   : > { %1284 = vpow2.f32 %v809_v11  ;;  %v833_v51 = vmul.f32 1.442695, %v819_v13  ;;  %v746_v62 = vsub.f32 %v1645_v45, %v1795_v55  ;;  %v825_v0 = vmul.f32 1.442695, %v815_v20 }
 0x144   : > { %1286 = vpow2.f32 %v821_v23  ;;  %v748_v58 = vsub.f32 %v1647_v46, %v1800_v53  ;;  %v751_v43 = vmul.f32 1.442695, %v742_v59  ;;  %v766_v41 = vsub.f32 %v1665_v3, %v1786_v9 }
 0x145   : > { %1288 = vpow2.f32 %v801_v12  ;;  %v755_v24 = vmul.f32 1.442695, %v744_v6  ;;  %v768_v42 = vsub.f32 %v1667_v4, %v1790_v52  ;;  %v759_v45 = vmul.f32 1.442695, %v746_v62  ;;  %v474_v12 = vpop.f32.mrf.mxu1 }
 0x146   : > { %v1812_v48 = vpop.eup %1264  ;;  %1290 = vpow2.f32 %v829_v54  ;;  %v770_v63 = vsub.f32 %v2068_v19, %v1795_v55  ;;  %v763_v2 = vmul.f32 1.442695, %v748_v58  ;;  %v772_v3 = vsub.f32 %v1673_v7, %v1800_v53 }
 0x147   : > { %v1816_v25 = vpop.eup %1266  ;;  %1292 = vpow2.f32 %v833_v51  ;;  %v775_v18 = vmul.f32 1.442695, %v766_v41  ;;  %v790_v4 = vsub.f32 %v1712_v60, %v1786_v9  ;;  %v779_v19 = vmul.f32 1.442695, %v768_v42 }
 0x148   : > { %v1820_v46 = vpop.eup %1268  ;;  %1294 = vpow2.f32 %v825_v0  ;;  %v792_v35 = vsub.f32 %v1729_v30, %v1790_v52  ;;  %v783_v7 = vmul.f32 1.442695, %v770_v63  ;;  %v794_v27 = vsub.f32 %v1740_v49, %v1795_v55  ;;  %v1892_v0 = vpop.f32.mrf.mxu1 }
 0x149   : > { %v1824_v1 = vpop.eup %1270  ;;  %1296 = vpow2.f32 %v751_v43  ;;  %v787_v33 = vmul.f32 1.442695, %v772_v3  ;;  %v796_v29 = vsub.f32 %v1743_v50, %v1800_v53  ;;  %v799_v34 = vmul.f32 1.442695, %v790_v4 }
 0x14a   : > { %v1828_v21 = vpop.eup %1272  ;;  %v837_v39 = vadd.f32 %v1824_v1, %v1812_v48  ;;  %1298 = vpow2.f32 %v755_v24  ;;  %v803_v14 = vmul.f32 1.442695, %v792_v35  ;;  %v807_v15 = vmul.f32 1.442695, %v794_v27  ;;  %v478_v42 = vpop.f32.mrf.mxu1 }
 0x14b   : > { %v1834_v26 = vpop.eup %1274  ;;  %1300 = vpow2.f32 %v759_v45  ;;  %v811_v57 = vmul.f32 1.442695, %v796_v29  ;;  %v814_v8 = vsub.f32 %v1771_v37, %v1786_v9  ;;  %v816_v40 = vsub.f32 %v1774_v44, %v1790_v52 }
 0x14c   : > { %v1838_v28 = vpop.eup %1276  ;;  %v841_v60 = vadd.f32 %v1834_v26, %v1820_v46  ;;  %1302 = vpow2.f32 %v763_v2  ;;  %v818_v10 = vsub.f32 %v1778_v22, %v1795_v55  ;;  %v820_v9 = vsub.f32 %v1781_v32, %v1800_v53  ;;  %v1918_v35 = vpop.f32.mrf.mxu1 }
 0x14d   : > { %v1844_v31 = vpop.eup %1278  ;;  %v843_v30 = vadd.f32 %v1838_v28, %v1828_v21  ;;  %1304 = vpow2.f32 %v775_v18  ;;  %v823_v44 = vmul.f32 1.442695, %v814_v8  ;;  %v827_v22 = vmul.f32 1.442695, %v816_v40 }
 0x14e   : > { %v1848_v5 = vpop.eup %1280  ;;  %v845_v49 = vadd.f32 %v1844_v31, %v837_v39  ;;  %1306 = vpow2.f32 %v779_v19  ;;  %v831_v59 = vmul.f32 1.442695, %v818_v10  ;;  %v835_v53 = vmul.f32 1.442695, %v820_v9  ;;  %v484_v8 = vpop.f32.mrf.mxu1 }
 0x14f   : > { %v1851_v61 = vpop.eup %1282  ;;  %1308 = vpow2.f32 %v783_v7  ;;  %v839_v16 = vadd.f32 %v1848_v5, %v1816_v25 }
 0x150   : > { %v1853_v38 = vpop.eup %1284  ;;  %v849_v50 = vadd.f32 %v1851_v61, %v841_v60  ;;  %1310 = vpow2.f32 %v787_v33 }
 0x151   : > { %v1858_v36 = vpop.eup %1286  ;;  %v851_v17 = vadd.f32 %v1853_v38, %v843_v30  ;;  %1312 = vpow2.f32 %v799_v34  ;;  %v339_v34 = vpop.permute.xlu1 %338 }
 0x152   : > { %v1865_v56 = vpop.eup %1288  ;;  %v853_v47 = vadd.f32 %v1858_v36, %v845_v49  ;;  %1314 = vpow2.f32 %v803_v14  ;;  %v479_v9 = vadd.f32 %v478_v42, %v339_v34 }
 0x153   : > { %v1870_v37 = vpop.eup %1290  ;;  %1316 = vpow2.f32 %v807_v15  ;;  %v847_v20 = vadd.f32 %v1865_v56, %v839_v16 }
 0x154   : > { %v1874_v11 = vpop.eup %1292  ;;  %v857_v13 = vadd.f32 %v1870_v37, %v849_v50  ;;  %1318 = vpow2.f32 %v811_v57  ;;  %v334_v57 = vpop.permute.xlu0 %333 }
 0x155   : > { %v1877_v52 = vpop.eup %1294  ;;  %v859_v23 = vadd.f32 %v1874_v11, %v851_v17  ;;  %1320 = vrcp.f32 %v853_v47  ;;  %v475_v10 = vadd.f32 %v474_v12, %v334_v57 }
 0x156   : > { %v1881_v55 = vpop.eup %1296  ;;  %1322 = vrcp.f32 %v857_v13  ;;  %v855_v51 = vadd.f32 %v1877_v52, %v847_v20 }
 0x157   : > { %v1883_v32 = vpop.eup %1298  ;;  %1324 = vrcp.f32 %v859_v23 }
 0x158   : > { %v1885_v54 = vpop.eup %1300  ;;  %1326 = vpow2.f32 %v823_v44  ;;  %v344_v42 = vpop.permute.xlu0 %343 }
 0x159   : > { %v1887_v6 = vpop.eup %1302  ;;  %1328 = vpow2.f32 %v827_v22  ;;  %v486_v22 = vpop.f32.mrf.mxu1 }
 0x15a   : > { %v1890_v62 = vpop.eup %1304  ;;  %1330 = vpow2.f32 %v831_v59 }
 0x15b   : > { %v1894_v58 = vpop.eup %1306  ;;  %1332 = vpow2.f32 %v835_v53  ;;  %v838_v45 = vadd.f32 %v1890_v62, %v1881_v55 }
 0x15c   : > { %v1896_v43 = vpop.eup %1308  ;;  %1334 = vrcp.f32 %v855_v51  ;;  %v840_v2 = vadd.f32 %v1894_v58, %v1883_v32 }
 0x15d   : > { %v1898_v41 = vpop.eup %1310  ;;  %v842_v18 = vadd.f32 %v1896_v43, %v1885_v54 }
 0x15e   : > { %v1900_v24 = vpop.eup %1312  ;;  %v844_v39 = vadd.f32 %v1898_v41, %v1887_v6 }
 0x15f   : > { %v1904_v63 = vpop.eup %1314  ;;  %v846_v7 = vadd.f32 %v1900_v24, %v838_v45 }
 0x160   : > { %v1908_v3 = vpop.eup %1316  ;;  %v848_v60 = vadd.f32 %v1904_v63, %v840_v2 }
 0x161   : > { %v1912_v4 = vpop.eup %1318  ;;  %v850_v29 = vadd.f32 %v1908_v3, %v842_v18 }
 0x162   : > { %v1916_v19 = vpop.eup %1320  ;;  %v852_v49 = vadd.f32 %v1912_v4, %v844_v39  ;;  %v488_v39 = vpop.f32.mrf.mxu1 }
 0x163   : > { %v1323_v27 = vpop.eup %1322  ;;  %v885_v53 = vmul.f32 %v1916_v19, %v1824_v1  ;;  %v349_v1 = vpop.permute.xlu1 %348 }
 0x164   : > { %v1325_v33 = vpop.eup %1324  ;;  %v873_v14 = vmul.f32 %v1323_v27, %v1820_v46  ;;  %v889_v15 = vmul.f32 %v1323_v27, %v1834_v26  ;;  %v869_v26 = vmul.f32 %v1916_v19, %v1812_v48  ;;  %v913_v51 = vmul.f32 %v1323_v27, %v1851_v61 }
 0x165   : > { %v1923_v30 = vpop.eup %1326  ;;  %v875_v17 = vmul.f32 %v1325_v33, %v1828_v21  ;;  %v891_v40 = vmul.f32 %v1325_v33, %v1838_v28  ;;  %v915_v45 = vmul.f32 %v1325_v33, %v1853_v38  ;;  %v485_v48 = vadd.f32 %v484_v8, %v344_v42 }
 0x166   : > { %v1928_v50 = vpop.eup %1328  ;;  %v854_v16 = vadd.f32 %v1923_v30, %v846_v7  ;;  %v881_v21 = vmul.f32 %v873_v14, %v475_v10  ;;  %v897_v23 = vmul.f32 %v889_v15, %v479_v9  ;;  %v937_v15 = vmul.f32 %v1323_v27, %v1870_v37 }
 0x167   : > { %v1933_v47 = vpop.eup %1330  ;;  %v856_v13 = vadd.f32 %v1928_v50, %v848_v60  ;;  %v883_v12 = vmul.f32 %v875_v17, %v475_v10  ;;  %v899_v59 = vmul.f32 %v891_v40, %v479_v9  ;;  %v877_v60 = vmul.f32 %v869_v26, %v475_v10  ;;  %v490_v40 = vpop.f32.mrf.mxu1 }
 0x168   : > { %v1936_v44 = vpop.eup %1332  ;;  %v858_v46 = vadd.f32 %v1933_v47, %v850_v29  ;;  %1336 = vrcp.f32 %v854_v16  ;;  %v905_v2 = vadd.f32 %v897_v23, %v881_v21  ;;  %v921_v14 = vmul.f32 %v913_v51, %v485_v48 }
 0x169   : > { %v860_v20 = vadd.f32 %v1936_v44, %v852_v49  ;;  %1338 = vrcp.f32 %v856_v13  ;;  %v1335_v28 = vpop.eup %1334  ;;  %v907_v7 = vadd.f32 %v899_v59, %v883_v12  ;;  %v893_v49 = vmul.f32 %v885_v53, %v479_v9 }
 0x16a   : > { %1340 = vrcp.f32 %v858_v46  ;;  %v871_v18 = vmul.f32 %v1335_v28, %v1816_v25  ;;  %v887_v29 = vmul.f32 %v1335_v28, %v1848_v5  ;;  %v923_v16 = vmul.f32 %v915_v45, %v485_v48 }
 0x16b   : > { %1342 = vrcp.f32 %v860_v20  ;;  %v939_v61 = vmul.f32 %v1325_v33, %v1874_v11  ;;  %v909_v38 = vmul.f32 %v1916_v19, %v1844_v31  ;;  %v1952_v8 = vadd.f32 %v488_v39, %v349_v1 }
 0x16c   : > { %v929_v17 = vadd.f32 %v921_v14, %v905_v2  ;;  %v911_v25 = vmul.f32 %v1335_v28, %v1865_v56  ;;  %v931_v13 = vadd.f32 %v923_v16, %v907_v7  ;;  %v879_v46 = vmul.f32 %v871_v18, %v475_v10 }
 0x16d   : > { %v895_v5 = vmul.f32 %v887_v29, %v479_v9  ;;  %v901_v26 = vadd.f32 %v893_v49, %v877_v60  ;;  %v477_v20 = vadd.f32 %v1892_v0, %v334_v57  ;;  %v945_v37 = vmul.f32 %v937_v15, %v1952_v8 }
 0x16e   : > { %v481_v27 = vadd.f32 %v1918_v35, %v339_v34  ;;  %v487_v11 = vadd.f32 %v486_v22, %v344_v42  ;;  %v947_v33 = vmul.f32 %v939_v61, %v1952_v8  ;;  %v917_v31 = vmul.f32 %v909_v38, %v485_v48 }
 0x16f   : > { %v491_v23 = vadd.f32 %v490_v40, %v349_v1  ;;  %v1959_v12 = vadd.f32 %v945_v37, %v929_v17  ;;  %v933_v56 = vmul.f32 %v1916_v19, %v1858_v36  ;;  %v935_v10 = vmul.f32 %v1335_v28, %v1877_v52 }
 0x170   : > { %v955_v59 = vadd.f32 %v947_v33, %v931_v13  ;;  %v903_v0 = vadd.f32 %v895_v5, %v879_v46  ;;  %v919_v57 = vmul.f32 %v911_v25, %v485_v48  ;;  %v925_v53 = vadd.f32 %v917_v31, %v901_v26 }
 0x172   : > { %v927_v40 = vadd.f32 %v919_v57, %v903_v0  ;;  %v963_v33 = vpack.c.bf16 %v955_v59, %v1959_v12  ;;  %v1263_v12 = vld [vmem:[%s2053_s3 + $0x8] sm:$0xff]  }
 0x175   : > { %v1337_v21 = vpop.eup %1336 }
 0x176   : > { %v1339_v9 = vpop.eup %1338  ;;  %v870_v35 = vmul.f32 %v1337_v21, %v1881_v55  ;;  %v886_v34 = vmul.f32 %v1337_v21, %v1890_v62  ;;  %v910_v22 = vmul.f32 %v1337_v21, %v1900_v24  ;;  %v934_v42 = vmul.f32 %v1337_v21, %v1923_v30 }
 0x177   : > { %v1341_v51 = vpop.eup %1340  ;;  %v872_v19 = vmul.f32 %v1339_v9, %v1883_v32  ;;  %v888_v62 = vmul.f32 %v1339_v9, %v1894_v58  ;;  %v936_v58 = vmul.f32 %v1339_v9, %v1928_v50  ;;  %v943_v50 = vmul.f32 %v935_v10, %v1952_v8 }
 0x178   : > { %v1343_v45 = vpop.eup %1342  ;;  %v874_v2 = vmul.f32 %v1341_v51, %v1885_v54  ;;  %v890_v36 = vmul.f32 %v1341_v51, %v1896_v43  ;;  %v914_v52 = vmul.f32 %v1341_v51, %v1908_v3  ;;  %v938_v30 = vmul.f32 %v1341_v51, %v1933_v47 }
 0x179   : > { %v876_v28 = vmul.f32 %v1343_v45, %v1887_v6  ;;  %v892_v48 = vmul.f32 %v1343_v45, %v1898_v41  ;;  %v916_v55 = vmul.f32 %v1343_v45, %v1912_v4  ;;  %v912_v54 = vmul.f32 %v1339_v9, %v1904_v63 }
 0x17a   : > { %v882_v24 = vmul.f32 %v874_v2, %v477_v20  ;;  %v898_v18 = vmul.f32 %v890_v36, %v481_v27  ;;  %v922_v7 = vmul.f32 %v914_v52, %v487_v11  ;;  %v940_v3 = vmul.f32 %v1343_v45, %v1936_v44 }
 0x17b   : > { %v884_v39 = vmul.f32 %v876_v28, %v477_v20  ;;  %v900_v43 = vmul.f32 %v892_v48, %v481_v27  ;;  %v878_v60 = vmul.f32 %v870_v35, %v477_v20  ;;  %v880_v6 = vmul.f32 %v872_v19, %v477_v20 }
 0x17c   : > { %v906_v32 = vadd.f32 %v898_v18, %v882_v24  ;;  %v894_v29 = vmul.f32 %v886_v34, %v481_v27  ;;  %v924_v49 = vmul.f32 %v916_v55, %v487_v11  ;;  %v896_v4 = vmul.f32 %v888_v62, %v481_v27 }
 0x17d   : > { %v908_v41 = vadd.f32 %v900_v43, %v884_v39  ;;  %v946_v15 = vmul.f32 %v938_v30, %v491_v23  ;;  %v918_v47 = vmul.f32 %v910_v22, %v487_v11  ;;  %v948_v63 = vmul.f32 %v940_v3, %v491_v23 }
 0x17e   : > { %v930_v14 = vadd.f32 %v922_v7, %v906_v32  ;;  %v902_v1 = vadd.f32 %v894_v29, %v878_v60  ;;  %v904_v61 = vadd.f32 %v896_v4, %v880_v6  ;;  %v920_v38 = vmul.f32 %v912_v54, %v487_v11 }
 0x17f   : > { %v932_v16 = vadd.f32 %v924_v49, %v908_v41  ;;  %v942_v44 = vmul.f32 %v934_v42, %v491_v23  ;;  %v944_v5 = vmul.f32 %v936_v58, %v491_v23  ;;  %v941_v20 = vmul.f32 %v933_v56, %v1952_v8  ;;  %v1262_v23 = vld [vmem:[%s2053_s3] sm:$0xff]   ;;  %v972_v56 = vpop.permute.xlu0 %971 }
 0x180   : > { %v954_v17 = vadd.f32 %v946_v15, %v930_v14  ;;  %v926_v25 = vadd.f32 %v918_v47, %v902_v1  ;;  %v928_v46 = vadd.f32 %v920_v38, %v904_v61  ;;  %v951_v11 = vadd.f32 %v943_v50, %v927_v40 }
 0x181   : > { %v956_v13 = vadd.f32 %v948_v63, %v932_v16  ;;  %v949_v31 = vadd.f32 %v941_v20, %v925_v53  ;;  %v2072_v8 = vmov 0   ;;  %v977_v53 = vpop.permute.xlu1 %976 }
 0x182   : > { %v950_v26 = vadd.f32 %v942_v44, %v926_v25  ;;  %v952_v27 = vadd.f32 %v944_v5, %v928_v46 }
 0x183   : > { %v964_v37 = vpack.c.bf16 %v956_v13, %v954_v17  ;;  %v961_v9 = vpack.c.bf16 %v951_v11, %v949_v31  ;;  %v982_v42 = vpop.permute.xlu0 %981 }
 0x184   : > { %v962_v21 = vpack.c.bf16 %v952_v27, %v950_v26 }
 0x185   : > { %1017 = vmatprep.subr.bf16.mxu1 %v964_v37  ;;  %v987_v19 = vpop.permute.xlu1 %986 }
 0x186   : > { %1018 = vmatpush1.bf16.msra.mxu1 %v963_v33 }
 0x187   : > { %1019 = vmatprep.subr.bf16.mxu1 %v962_v21 }
 0x18a   : > { %1020 = vmatpush1.bf16.msra.mxu1 %v961_v9 }
 0x18d   : > { %1183 = vmatmul.mubr.msk.bf16.vlgmr.msra.gmra.mxu1 %vm381_vm0, %v1262_v23 }
 0x18e   : > { %1047 = vmatprep.mubr.bf16.mxu1 %v2072_v8 }
 0x195   : > { %1184 = vmatmul.mubr.msk.bf16.gmra.mxu1 %vm381_vm0, %v1263_v12 }
 0x24d   : > { %v1039_v10 = vpop.f32.mrf.mxu1 }
 0x24e   : > { %v1040_v59 = vadd.f32 %v1039_v10, %v972_v56 }
 0x24f   : > { %v1041_v0 = vpop.f32.mrf.mxu1 }
 0x250   : > { %1058 = vst [vmem:[%s242_s17] sm:$0xff] %v1040_v59  ;;  %v1042_v57 = vadd.f32 %v1041_v0, %v972_v56 }
 0x251   : > { %v1043_v51 = vpop.f32.mrf.mxu1 }
 0x252   : > { %1059 = vst [vmem:[%s242_s17 + $0x8] sm:$0xff] %v1042_v57  ;;  %v1044_v35 = vadd.f32 %v1043_v51, %v977_v53 }
 0x253   : > { %v1045_v34 = vpop.f32.mrf.mxu1 }
 0x254   : > { %1060 = vst [vmem:[%s242_s17 + $0x10] sm:$0xff] %v1044_v35  ;;  %v1046_v22 = vadd.f32 %v1045_v34, %v977_v53 }
 0x255   : > { %v1049_v45 = vpop.f32.mrf.mxu1 }
 0x256   : > { %1061 = vst [vmem:[%s242_s17 + $0x18] sm:$0xff] %v1046_v22  ;;  %v1050_v2 = vadd.f32 %v1049_v45, %v982_v42 }
 0x257   : > { %v1051_v36 = vpop.f32.mrf.mxu1 }
 0x258   : > { %1062 = vst [vmem:[%s242_s17 + $0x20] sm:$0xff] %v1050_v2  ;;  %v1052_v52 = vadd.f32 %v1051_v36, %v982_v42 }
 0x259   : > { %v1053_v28 = vpop.f32.mrf.mxu1 }
 0x25a   : > { %1063 = vst [vmem:[%s242_s17 + $0x28] sm:$0xff] %v1052_v52  ;;  %v1054_v48 = vadd.f32 %v1053_v28, %v987_v19 }
 0x25b   : > { %v1055_v55 = vpop.f32.mrf.mxu1 }
 0x25c   : > { %1064 = vst [vmem:[%s242_s17 + $0x30] sm:$0xff] %v1054_v48  ;;  %v1056_v62 = vadd.f32 %v1055_v55, %v987_v19 }
 0x25e   : > { %1065 = vst [vmem:[%s242_s17 + $0x38] sm:$0xff] %v1056_v62 }
 0x25f   : > { %1357 = shalt.err (!%p1354_p5)
}
 0x260   : > { %s1358_s12 = scalar_lea.hbm %s1999_s7, 1024  ;;  %s1362_s15 = scalar_lea.hbm %s2055_s5, 2048 }
 0x261   : > { %p1359_p6 = scmp.ne.s32.totalorder %s1999_s7, %s1358_s12  ;;  %p1363_p10 = scmp.lt.s32.totalorder %s1999_s7, %s2055_s5 }
 0x262   : > { %p1364_p11 = scmp.lt.s32.totalorder %s1362_s15, %s1358_s12 }
 0x263   : > { %p1360_p7 = pnand %p1359_p6, %p1496_p4 }
 0x264   : > { %p1365_p12 = por %p1364_p11, %p1363_p10 }
 0x265   : > { %p1361_p9 = pneg %p1360_p7 }
 0x267   : > { %p1366_p13 = pnand %p1365_p12, %p1361_p9 }
 0x269   : > { %1369 = shalt.err (!%p1366_p13)
}
 0x26a   : > { %s1424_s24 = smov 256   ;;  %s1425_s27 = smov 16  }
 0x26b   : > { %1196 = dma.vmem_to_hbm [thread:$0]  (%p1496_p4), %s2001_s25, 1024, %s1999_s7, %s2005_s21, %s1424_s24, %s1424_s24, %s1425_s27  }
 0x26c PF: > { %p1202_p0 = scmp.ge.s32.totalorder %s1420_s23, 2  ;;  %s1097_s29 = sand.u32 1, %s1400_s18  }
 0x26d   : > { %s1098_s8 = scalar_lea.sflag [#allocation3], %s1097_s29 }
 0x26e   : > { %p1199_p1 = pnand %p1202_p0, %p1503_p8 }
 0x270   : > { %p1200_p2 = pneg %p1199_p1 }
 0x272   : > { %1395 = dma.done.wait (%p1200_p2), %s1098_s8, 1024  }
 0x273   : > { %1397 = vsyncadd (%p1200_p2), %s1098_s8, 4294966272  ;;  %s18_s23 = sadd.s32 1, %s1420_s23   ;;  %s2073_s18 = smov %s1404_s19 }
 0x274   : > { %p15_p3 = scmp.ge.s32.totalorder %s18_s23, 4   ;;  %s2074_s19 = smov %s1408_s20 }
 0x275   : > { %s2075_s20 = smov %s1509_s6  ;;  %s2076_s21 = smov %s1416_s22 }
 0x276   : > { %s2077_s22 = smov %s2079_s26  ;;  %17 = sbr.rel (!%p15_p3) target bundleno = 4 (0x4), region = 75 }
 0x27b   :  { %1103 = vsyncpa [#allocation3], 1 }
 0x27c   :  { %1105 = vsyncpa [#allocation3 + $0x1], 1 }

</bundles_post_ra>
